<compile_context>
chip_gen: v6e
topology: v6e:2x2x1
jax: 0.10.0
libtpu: 0.0.40
codegen_flags: <defaults>
</compile_context>

<pallas_src>
import jax
import jax.numpy as jnp
from jax import lax
from jax.experimental import pallas as pl
from jax.experimental.pallas import tpu as pltpu

KH = KW = 3
C0 = 10          # cnn_0 out channels (fixed by the module)
C1 = 5           # cnn_1 out channels (fixed by the module)
BT = 8           # samples per grid step (one f32 sublane tile)


def _layout_sizes(H, W):
    """Row lengths of the lane-flattened (stride-W) activation layout."""
    H1, W1 = H - (KH - 1), W - (KW - 1)          # after conv_0 (valid)
    H2, W2 = H1 - (KH - 1), W1 - (KW - 1)        # after conv_1 (valid)
    L0 = (H1 - 1) * W + W1                       # conv_0 output row length (incl. garbage cols)
    L1 = (H2 - 1) * W + W2                       # conv_1 output row length (incl. garbage cols)
    return H1, W1, H2, W2, L0, L1


# ------------------------------ fused kernel --------------------------------
def _make_actor_kernel(H, W, cin, bt):
    _, _, _, _, L0, L1 = _layout_sizes(H, W)
    HW = H * W

    def kernel(x_ref, w0_ref, b0_ref, w1_ref, b1_ref,
               wf0_ref, bf0_ref, wf1_ref, bf1_ref, o_ref, h1s_ref):
        # Weights hoisted out of the per-sample loop (loaded once per grid step).
        w0 = w0_ref[...]                          # (9, C0, cin)
        b0 = b0_ref[...]                          # (C0, 1)
        w1 = w1_ref[...]                          # (9, C1, C0)
        b1 = b1_ref[...]                          # (C1, 1)

        # ---- conv stage: per-sample, streamed through the (bt, C1, L1) VMEM scratch ----
        def conv_one(i, carry):
            x = x_ref[i]                                          # (cin, HW)
            # 3 kw lane-shifted copies, reused by every kh (6 shifts/conv instead of 9).
            x_sh = [x[:, kw:kw + HW - 2] for kw in range(KW)]     # each (cin, HW-2)

            acc0 = jnp.zeros((C0, L0), jnp.float32)
            for kh in range(KH):
                if cin == 1:                                      # lane-dense VPU MACs
                    r = (w0[kh * KW + 0] * x_sh[0]
                         + w0[kh * KW + 1] * x_sh[1]
                         + w0[kh * KW + 2] * x_sh[2])             # (C0, HW-2)
                else:                                             # tiny MXU matmuls
                    r = (jnp.dot(w0[kh * KW + 0], x_sh[0], preferred_element_type=jnp.float32)
                         + jnp.dot(w0[kh * KW + 1], x_sh[1], preferred_element_type=jnp.float32)
                         + jnp.dot(w0[kh * KW + 2], x_sh[2], preferred_element_type=jnp.float32))
                acc0 = acc0 + r[:, kh * W:kh * W + L0]
            h0 = jnp.maximum(acc0 + b0, 0.0)                      # (C0, L0)

            h0_sh = [h0[:, kw:kw + L0 - 2] for kw in range(KW)]   # each (C0, L0-2)
            acc1 = jnp.zeros((C1, L1), jnp.float32)
            for kh in range(KH):                                  # 3 independent MXU chains
                r = (jnp.dot(w1[kh * KW + 0], h0_sh[0], preferred_element_type=jnp.float32)
                     + jnp.dot(w1[kh * KW + 1], h0_sh[1], preferred_element_type=jnp.float32)
                     + jnp.dot(w1[kh * KW + 2], h0_sh[2], preferred_element_type=jnp.float32))
                acc1 = acc1 + r[:, kh * W:kh * W + L1]
            h1 = jnp.maximum(acc1 + b1, 0.0)                      # (C1, L1)

            h1s_ref[i] = h1
            return carry

        lax.fori_loop(0, bt, conv_one, 0)

        # ---- fc tail: batched (M = bt) MXU matmuls over the whole block ----------------
        # fc_0 + ReLU: the NCHW flatten is folded into zero-padded per-channel weight
        # slabs (garbage layout columns hit all-zero weight rows), so this is just C1
        # accumulated matmuls.  3 independent accumulators keep the MXU FIFO pipelined.
        # TODO(synk): on v7x the MRB could accumulate these in place via
        # pltpu.matmul_push_rhs/matmul_acc_lhs/matmul_pop.
        a0 = jnp.dot(h1s_ref[:, 0, :], wf0_ref[0], preferred_element_type=jnp.float32)
        a1 = jnp.dot(h1s_ref[:, 1, :], wf0_ref[1], preferred_element_type=jnp.float32)
        a2 = jnp.dot(h1s_ref[:, 2, :], wf0_ref[2], preferred_element_type=jnp.float32)
        a0 = a0 + jnp.dot(h1s_ref[:, 3, :], wf0_ref[3], preferred_element_type=jnp.float32)
        a1 = a1 + jnp.dot(h1s_ref[:, 4, :], wf0_ref[4], preferred_element_type=jnp.float32)
        h = jnp.maximum(a0 + a1 + a2 + bf0_ref[...], 0.0)         # (bt, hidden)

        # fc_1 + softmax(dim=1) — exact normalization (PPO needs sum(prob)==1).
        logits = jnp.dot(h, wf1_ref[...], preferred_element_type=jnp.float32) + bf1_ref[...]
        z = jnp.exp(logits - jnp.max(logits, axis=-1, keepdims=True))
        o_ref[...] = z / jnp.sum(z, axis=-1, keepdims=True)       # (bt, n_act)

    return kernel


# ------------------------------- wrapper -------------------------------------
@jax.jit
def actor_cnn_forward(params, x_nchw):
    """x_nchw: (N, C, H, W) float32 (or unbatched (C, H, W)), like the PyTorch module."""
    if x_nchw.ndim == 3:                      # unbatched branch of the module
        x_nchw = x_nchw[None]
    N, cin, H, W = x_nchw.shape
    x_flat = x_nchw.reshape(N, cin, H * W)    # NCHW with HW flattened — no transpose needed

    w0, b0 = params['w_cnn0'], params['b_cnn0']
    w1, b1 = params['w_cnn1'], params['b_cnn1']
    wf0, bf0 = params['w_fc0'], params['b_fc0']
    wf1, bf1 = params['w_fc1'], params['b_fc1']
    n_act = wf1.shape[1]
    _, _, _, _, _, L1 = _layout_sizes(H, W)
    assert wf0.shape == (C1, L1, bf0.shape[1]), "fc_0 weight not in fused-kernel layout"

    bt = BT
    n_blocks = pl.cdiv(N, bt)
    n_pad = n_blocks * bt
    if n_pad != N:                            # pad batch to a whole number of blocks
        x_flat = jnp.pad(x_flat, ((0, n_pad - N), (0, 0), (0, 0)))

    out = pl.pallas_call(
        _make_actor_kernel(H, W, cin, bt),
        out_shape=jax.ShapeDtypeStruct((n_pad, n_act), jnp.float32),
        grid_spec=pltpu.PrefetchScalarGridSpec(
            num_scalar_prefetch=0,
            grid=(n_blocks,),
            in_specs=[
                pl.BlockSpec((bt, cin, H * W), lambda i: (i, 0, 0)),
                pl.BlockSpec(w0.shape, lambda i: (0, 0, 0)),
                pl.BlockSpec(b0.shape, lambda i: (0, 0)),
                pl.BlockSpec(w1.shape, lambda i: (0, 0, 0)),
                pl.BlockSpec(b1.shape, lambda i: (0, 0)),
                pl.BlockSpec(wf0.shape, lambda i: (0, 0, 0)),
                pl.BlockSpec(bf0.shape, lambda i: (0, 0)),
                pl.BlockSpec(wf1.shape, lambda i: (0, 0)),
                pl.BlockSpec(bf1.shape, lambda i: (0, 0)),
            ],
            out_specs=pl.BlockSpec((bt, n_act), lambda i: (i, 0)),
            scratch_shapes=[pltpu.VMEM((bt, C1, L1), jnp.float32)],
        ),
        compiler_params=pltpu.CompilerParams(
            dimension_semantics=("parallel",)),   # v7x: two TensorCores split the blocks
    )(x_flat, w0, b0, w1, b1, wf0, bf0, wf1, bf1)
    # TODO(synk): torch.distributions.Categorical has no Pallas equivalent; we return the
    # categorical probabilities that parameterize it.
    return out[:N]


# ----------------------------- parameter setup -------------------------------
def _fold_flatten_into_fc0(w_rows, H, W):
    """(C1*H2*W2, hidden) rows in PyTorch NCHW-flatten order -> (C1, L1, hidden)
    zero-padded slab matching the kernel's stride-W activation layout."""
    _, _, H2, W2, _, L1 = _layout_sizes(H, W)
    hidden = w_rows.shape[1]
    w = w_rows.reshape(C1, H2, W2, hidden)
    w = jnp.pad(w, ((0, 0), (0, 0), (0, W - W2), (0, 0)))   # zeros at garbage columns
    return w.reshape(C1, H2 * W, hidden)[:, :L1, :]


def init_params(key, state_space, action_space, in_channels=1, hidden=64):
    """Random params matching ActorCNN.__init__ (uniform +-1/sqrt(fan_in)), stored in the
    layouts the fused kernel consumes.  To load a real PyTorch checkpoint: conv weight
    (co,ci,kh,kw) -> (kh*kw, co, ci); fc_0 weight (hidden, flat) -> transpose, then
    _fold_flatten_into_fc0 (keeps NCHW flatten order consistent)."""
    _, H, W = state_space
    _, _, H2, W2, _, _ = _layout_sizes(H, W)
    flat_size = H2 * W2 * C1
    ks = jax.random.split(key, 8)

    def unif(k, shape, fan_in):
        b = 1.0 / float(fan_in) ** 0.5
        return jax.random.uniform(k, shape, jnp.float32, -b, b)

    w_fc0_rows = unif(ks[4], (flat_size, hidden), flat_size)   # torch-order rows
    return dict(
        w_cnn0=unif(ks[0], (KH * KW, C0, in_channels), in_channels * KH * KW),
        b_cnn0=unif(ks[1], (C0, 1), in_channels * KH * KW),
        w_cnn1=unif(ks[2], (KH * KW, C1, C0), C0 * KH * KW),
        b_cnn1=unif(ks[3], (C1, 1), C0 * KH * KW),
        w_fc0=_fold_flatten_into_fc0(w_fc0_rows, H, W),
        w_fc0_rows=w_fc0_rows,                  # torch-order copy (reference check only)
        b_fc0=unif(ks[5], (1, hidden), flat_size),
        w_fc1=unif(ks[6], (hidden, action_space), hidden),
        b_fc1=unif(ks[7], (1, action_space), hidden),
    )


# --------------------------- pure-JAX reference ------------------------------
def reference_forward(params, x_nchw):
    """Plain-jnp replica of the PyTorch module forward (correctness oracle)."""
    if x_nchw.ndim == 3:
        x_nchw = x_nchw[None]
    N = x_nchw.shape[0]

    def conv_relu(x, w_taps, b):     # valid 3x3; taps (9, co, ci), bias (co, 1)
        co = w_taps.shape[1]
        hh, ww = x.shape[2] - 2, x.shape[3] - 2
        acc = jnp.zeros((x.shape[0], co, hh, ww), jnp.float32)
        for kh in range(KH):
            for kw in range(KW):
                acc = acc + jnp.einsum('oc,nchw->nohw', w_taps[kh * KW + kw],
                                       x[:, :, kh:kh + hh, kw:kw + ww])
        return jnp.maximum(acc + b[None, :, :, None], 0.0)

    h0 = conv_relu(x_nchw, params['w_cnn0'], params['b_cnn0'])
    h1 = conv_relu(h0, params['w_cnn1'], params['b_cnn1'])
    flat = h1.reshape(N, -1)                                  # NCHW flatten (torch order)
    h = jnp.maximum(flat @ params['w_fc0_rows'] + params['b_fc0'], 0.0)
    logits = h @ params['w_fc1'] + params['b_fc1']
    return jax.nn.softmax(logits, axis=1)


if __name__ == "__main__":
    key = jax.random.PRNGKey(0)
    k_param, k_x = jax.random.split(key)

    state_space = (1, 16, 16)     # (C, H, W)
    action_space = 2              # cartpole
    in_channels = 1
    params = init_params(k_param, state_space, action_space, in_channels)

    ok = True
    for batch in (2, 13):         # 2: single padded block; 13: multi-block grid + remainder
        kx = jax.random.fold_in(k_x, batch)
        x = jax.random.normal(kx, (batch, in_channels,
                                   state_space[1], state_space[2]), jnp.float32)
        probs = jax.block_until_ready(actor_cnn_forward(params, x))
        ref = jax.block_until_ready(reference_forward(params, x))

        ok &= probs.shape == (batch, action_space)
        ok &= bool(jnp.all(jnp.isfinite(probs)))
        ok &= bool(jnp.allclose(jnp.sum(probs, axis=1), 1.0, atol=1e-5))   # exact softmax
        ok &= bool(jnp.allclose(probs, ref, atol=2e-3))

    assert ok
    print("KERNEL_OK")
</pallas_src>

<mosaic_0001>
module attributes {stable_mosaic.version = 11 : i64} {
  func.func @kernel(%arg0: i32, %arg1: memref<8x1x256xf32, #tpu.memory_space<vmem>>, %arg2: memref<9x10x1xf32, #tpu.memory_space<vmem>>, %arg3: memref<10x1xf32, #tpu.memory_space<vmem>>, %arg4: memref<9x5x10xf32, #tpu.memory_space<vmem>>, %arg5: memref<5x1xf32, #tpu.memory_space<vmem>>, %arg6: memref<5x188x64xf32, #tpu.memory_space<vmem>>, %arg7: memref<1x64xf32, #tpu.memory_space<vmem>>, %arg8: memref<64x2xf32, #tpu.memory_space<vmem>>, %arg9: memref<1x2xf32, #tpu.memory_space<vmem>>, %arg10: memref<8x2xf32, #tpu.memory_space<vmem>>, %arg11: memref<8x5x188xf32, #tpu.memory_space<vmem>>) attributes {dimension_semantics = [#tpu.dimension_semantics<parallel>], iteration_bounds = array<i64: 1>, scalar_prefetch = 0 : i64, scratch_operands = 1 : i64, tpu.core_type = #tpu.core_type<tc>, window_params = [{transform_indices = @transform_0, window_bounds = array<i64: 8, 1, 256>}, {pipeline_mode = #tpu.pipeline_mode<synchronous>, transform_indices = @transform_1, window_bounds = array<i64: 9, 10, 1>}, {pipeline_mode = #tpu.pipeline_mode<synchronous>, transform_indices = @transform_2, window_bounds = array<i64: 10, 1>}, {pipeline_mode = #tpu.pipeline_mode<synchronous>, transform_indices = @transform_3, window_bounds = array<i64: 9, 5, 10>}, {pipeline_mode = #tpu.pipeline_mode<synchronous>, transform_indices = @transform_4, window_bounds = array<i64: 5, 1>}, {pipeline_mode = #tpu.pipeline_mode<synchronous>, transform_indices = @transform_5, window_bounds = array<i64: 5, 188, 64>}, {pipeline_mode = #tpu.pipeline_mode<synchronous>, transform_indices = @transform_6, window_bounds = array<i64: 1, 64>}, {pipeline_mode = #tpu.pipeline_mode<synchronous>, transform_indices = @transform_7, window_bounds = array<i64: 64, 2>}, {pipeline_mode = #tpu.pipeline_mode<synchronous>, transform_indices = @transform_8, window_bounds = array<i64: 1, 2>}, {transform_indices = @transform_9, window_bounds = array<i64: 8, 2>}]} {
    %c0 = arith.constant 0 : index
    %c0_0 = arith.constant 0 : index
    %c0_1 = arith.constant 0 : index
    %0 = vector.load %arg2[%c0, %c0_0, %c0_1] : memref<9x10x1xf32, #tpu.memory_space<vmem>>, vector<9x10x1xf32>
    %c0_2 = arith.constant 0 : index
    %c0_3 = arith.constant 0 : index
    %1 = vector.load %arg3[%c0_2, %c0_3] : memref<10x1xf32, #tpu.memory_space<vmem>>, vector<10x1xf32>
    %c0_4 = arith.constant 0 : index
    %c0_5 = arith.constant 0 : index
    %c0_6 = arith.constant 0 : index
    %2 = vector.load %arg4[%c0_4, %c0_5, %c0_6] : memref<9x5x10xf32, #tpu.memory_space<vmem>>, vector<9x5x10xf32>
    %c0_7 = arith.constant 0 : index
    %c0_8 = arith.constant 0 : index
    %3 = vector.load %arg5[%c0_7, %c0_8] : memref<5x1xf32, #tpu.memory_space<vmem>>, vector<5x1xf32>
    %c0_i32 = arith.constant 0 : i32
    %c8_i32 = arith.constant 8 : i32
    %4 = arith.addi %c0_i32, %c8_i32 : i32
    %c1_i32 = arith.constant 1 : i32
    scf.for %arg12 = %c0_i32 to %4 step %c1_i32  : i32 {
      %54 = arith.index_cast %arg12 : i32 to index
      %c0_52 = arith.constant 0 : index
      %c0_53 = arith.constant 0 : index
      %55 = vector.load %arg1[%54, %c0_52, %c0_53] : memref<8x1x256xf32, #tpu.memory_space<vmem>>, vector<1x1x256xf32>
      %56 = vector.shape_cast %55 : vector<1x1x256xf32> to vector<1x256xf32>
      %57 = vector.extract_strided_slice %56 {offsets = [0, 0], sizes = [1, 254], strides = [1, 1]} : vector<1x256xf32> to vector<1x254xf32>
      %58 = vector.extract_strided_slice %56 {offsets = [0, 1], sizes = [1, 254], strides = [1, 1]} : vector<1x256xf32> to vector<1x254xf32>
      %59 = vector.extract_strided_slice %56 {offsets = [0, 2], sizes = [1, 254], strides = [1, 1]} : vector<1x256xf32> to vector<1x254xf32>
      %cst_54 = arith.constant 0.000000e+00 : f32
      %60 = vector.broadcast %cst_54 : f32 to vector<10x222xf32>
      %61 = vector.extract_strided_slice %0 {offsets = [0, 0, 0], sizes = [1, 10, 1], strides = [1, 1, 1]} : vector<9x10x1xf32> to vector<1x10x1xf32>
      %62 = vector.shape_cast %61 : vector<1x10x1xf32> to vector<10x1xf32>
      %63 = vector.broadcast %62 : vector<10x1xf32> to vector<10x254xf32>
      %64 = vector.broadcast %57 : vector<1x254xf32> to vector<10x254xf32>
      %65 = arith.mulf %63, %64 : vector<10x254xf32>
      %66 = vector.extract_strided_slice %0 {offsets = [1, 0, 0], sizes = [1, 10, 1], strides = [1, 1, 1]} : vector<9x10x1xf32> to vector<1x10x1xf32>
      %67 = vector.shape_cast %66 : vector<1x10x1xf32> to vector<10x1xf32>
      %68 = vector.broadcast %67 : vector<10x1xf32> to vector<10x254xf32>
      %69 = vector.broadcast %58 : vector<1x254xf32> to vector<10x254xf32>
      %70 = arith.mulf %68, %69 : vector<10x254xf32>
      %71 = arith.addf %65, %70 : vector<10x254xf32>
      %72 = vector.extract_strided_slice %0 {offsets = [2, 0, 0], sizes = [1, 10, 1], strides = [1, 1, 1]} : vector<9x10x1xf32> to vector<1x10x1xf32>
      %73 = vector.shape_cast %72 : vector<1x10x1xf32> to vector<10x1xf32>
      %74 = vector.broadcast %73 : vector<10x1xf32> to vector<10x254xf32>
      %75 = vector.broadcast %59 : vector<1x254xf32> to vector<10x254xf32>
      %76 = arith.mulf %74, %75 : vector<10x254xf32>
      %77 = arith.addf %71, %76 : vector<10x254xf32>
      %78 = vector.extract_strided_slice %77 {offsets = [0, 0], sizes = [10, 222], strides = [1, 1]} : vector<10x254xf32> to vector<10x222xf32>
      %79 = arith.addf %60, %78 : vector<10x222xf32>
      %80 = vector.extract_strided_slice %0 {offsets = [3, 0, 0], sizes = [1, 10, 1], strides = [1, 1, 1]} : vector<9x10x1xf32> to vector<1x10x1xf32>
      %81 = vector.shape_cast %80 : vector<1x10x1xf32> to vector<10x1xf32>
      %82 = vector.broadcast %81 : vector<10x1xf32> to vector<10x254xf32>
      %83 = vector.broadcast %57 : vector<1x254xf32> to vector<10x254xf32>
      %84 = arith.mulf %82, %83 : vector<10x254xf32>
      %85 = vector.extract_strided_slice %0 {offsets = [4, 0, 0], sizes = [1, 10, 1], strides = [1, 1, 1]} : vector<9x10x1xf32> to vector<1x10x1xf32>
      %86 = vector.shape_cast %85 : vector<1x10x1xf32> to vector<10x1xf32>
      %87 = vector.broadcast %86 : vector<10x1xf32> to vector<10x254xf32>
      %88 = vector.broadcast %58 : vector<1x254xf32> to vector<10x254xf32>
      %89 = arith.mulf %87, %88 : vector<10x254xf32>
      %90 = arith.addf %84, %89 : vector<10x254xf32>
      %91 = vector.extract_strided_slice %0 {offsets = [5, 0, 0], sizes = [1, 10, 1], strides = [1, 1, 1]} : vector<9x10x1xf32> to vector<1x10x1xf32>
      %92 = vector.shape_cast %91 : vector<1x10x1xf32> to vector<10x1xf32>
      %93 = vector.broadcast %92 : vector<10x1xf32> to vector<10x254xf32>
      %94 = vector.broadcast %59 : vector<1x254xf32> to vector<10x254xf32>
      %95 = arith.mulf %93, %94 : vector<10x254xf32>
      %96 = arith.addf %90, %95 : vector<10x254xf32>
      %97 = vector.extract_strided_slice %96 {offsets = [0, 16], sizes = [10, 222], strides = [1, 1]} : vector<10x254xf32> to vector<10x222xf32>
      %98 = arith.addf %79, %97 : vector<10x222xf32>
      %99 = vector.extract_strided_slice %0 {offsets = [6, 0, 0], sizes = [1, 10, 1], strides = [1, 1, 1]} : vector<9x10x1xf32> to vector<1x10x1xf32>
      %100 = vector.shape_cast %99 : vector<1x10x1xf32> to vector<10x1xf32>
      %101 = vector.broadcast %100 : vector<10x1xf32> to vector<10x254xf32>
      %102 = vector.broadcast %57 : vector<1x254xf32> to vector<10x254xf32>
      %103 = arith.mulf %101, %102 : vector<10x254xf32>
      %104 = vector.extract_strided_slice %0 {offsets = [7, 0, 0], sizes = [1, 10, 1], strides = [1, 1, 1]} : vector<9x10x1xf32> to vector<1x10x1xf32>
      %105 = vector.shape_cast %104 : vector<1x10x1xf32> to vector<10x1xf32>
      %106 = vector.broadcast %105 : vector<10x1xf32> to vector<10x254xf32>
      %107 = vector.broadcast %58 : vector<1x254xf32> to vector<10x254xf32>
      %108 = arith.mulf %106, %107 : vector<10x254xf32>
      %109 = arith.addf %103, %108 : vector<10x254xf32>
      %110 = vector.extract_strided_slice %0 {offsets = [8, 0, 0], sizes = [1, 10, 1], strides = [1, 1, 1]} : vector<9x10x1xf32> to vector<1x10x1xf32>
      %111 = vector.shape_cast %110 : vector<1x10x1xf32> to vector<10x1xf32>
      %112 = vector.broadcast %111 : vector<10x1xf32> to vector<10x254xf32>
      %113 = vector.broadcast %59 : vector<1x254xf32> to vector<10x254xf32>
      %114 = arith.mulf %112, %113 : vector<10x254xf32>
      %115 = arith.addf %109, %114 : vector<10x254xf32>
      %116 = vector.extract_strided_slice %115 {offsets = [0, 32], sizes = [10, 222], strides = [1, 1]} : vector<10x254xf32> to vector<10x222xf32>
      %117 = arith.addf %98, %116 : vector<10x222xf32>
      %118 = vector.broadcast %1 : vector<10x1xf32> to vector<10x222xf32>
      %119 = arith.addf %117, %118 : vector<10x222xf32>
      %cst_55 = arith.constant 0.000000e+00 : f32
      %120 = vector.broadcast %cst_55 : f32 to vector<10x222xf32>
      %121 = arith.maximumf %119, %120 : vector<10x222xf32>
      %122 = vector.extract_strided_slice %121 {offsets = [0, 0], sizes = [10, 220], strides = [1, 1]} : vector<10x222xf32> to vector<10x220xf32>
      %123 = vector.extract_strided_slice %121 {offsets = [0, 1], sizes = [10, 220], strides = [1, 1]} : vector<10x222xf32> to vector<10x220xf32>
      %124 = vector.extract_strided_slice %121 {offsets = [0, 2], sizes = [10, 220], strides = [1, 1]} : vector<10x222xf32> to vector<10x220xf32>
      %cst_56 = arith.constant 0.000000e+00 : f32
      %125 = vector.broadcast %cst_56 : f32 to vector<5x188xf32>
      %126 = vector.extract_strided_slice %2 {offsets = [0, 0, 0], sizes = [1, 5, 10], strides = [1, 1, 1]} : vector<9x5x10xf32> to vector<1x5x10xf32>
      %127 = vector.shape_cast %126 : vector<1x5x10xf32> to vector<5x10xf32>
      %cst_57 = arith.constant dense<0.000000e+00> : vector<5x220xf32>
      %128 = tpu.matmul %127, %122, %cst_57 {dimension_numbers = #tpu.dot_dimension_numbers<[1], [0], [0], [1], [0, 0, 1, 1], [], []>} : vector<5x10xf32>, vector<10x220xf32>, vector<5x220xf32> -> vector<5x220xf32>
      %129 = vector.extract_strided_slice %2 {offsets = [1, 0, 0], sizes = [1, 5, 10], strides = [1, 1, 1]} : vector<9x5x10xf32> to vector<1x5x10xf32>
      %130 = vector.shape_cast %129 : vector<1x5x10xf32> to vector<5x10xf32>
      %cst_58 = arith.constant dense<0.000000e+00> : vector<5x220xf32>
      %131 = tpu.matmul %130, %123, %cst_58 {dimension_numbers = #tpu.dot_dimension_numbers<[1], [0], [0], [1], [0, 0, 1, 1], [], []>} : vector<5x10xf32>, vector<10x220xf32>, vector<5x220xf32> -> vector<5x220xf32>
      %132 = arith.addf %128, %131 : vector<5x220xf32>
      %133 = vector.extract_strided_slice %2 {offsets = [2, 0, 0], sizes = [1, 5, 10], strides = [1, 1, 1]} : vector<9x5x10xf32> to vector<1x5x10xf32>
      %134 = vector.shape_cast %133 : vector<1x5x10xf32> to vector<5x10xf32>
      %cst_59 = arith.constant dense<0.000000e+00> : vector<5x220xf32>
      %135 = tpu.matmul %134, %124, %cst_59 {dimension_numbers = #tpu.dot_dimension_numbers<[1], [0], [0], [1], [0, 0, 1, 1], [], []>} : vector<5x10xf32>, vector<10x220xf32>, vector<5x220xf32> -> vector<5x220xf32>
      %136 = arith.addf %132, %135 : vector<5x220xf32>
      %137 = vector.extract_strided_slice %136 {offsets = [0, 0], sizes = [5, 188], strides = [1, 1]} : vector<5x220xf32> to vector<5x188xf32>
      %138 = arith.addf %125, %137 : vector<5x188xf32>
      %139 = vector.extract_strided_slice %2 {offsets = [3, 0, 0], sizes = [1, 5, 10], strides = [1, 1, 1]} : vector<9x5x10xf32> to vector<1x5x10xf32>
      %140 = vector.shape_cast %139 : vector<1x5x10xf32> to vector<5x10xf32>
      %cst_60 = arith.constant dense<0.000000e+00> : vector<5x220xf32>
      %141 = tpu.matmul %140, %122, %cst_60 {dimension_numbers = #tpu.dot_dimension_numbers<[1], [0], [0], [1], [0, 0, 1, 1], [], []>} : vector<5x10xf32>, vector<10x220xf32>, vector<5x220xf32> -> vector<5x220xf32>
      %142 = vector.extract_strided_slice %2 {offsets = [4, 0, 0], sizes = [1, 5, 10], strides = [1, 1, 1]} : vector<9x5x10xf32> to vector<1x5x10xf32>
      %143 = vector.shape_cast %142 : vector<1x5x10xf32> to vector<5x10xf32>
      %cst_61 = arith.constant dense<0.000000e+00> : vector<5x220xf32>
      %144 = tpu.matmul %143, %123, %cst_61 {dimension_numbers = #tpu.dot_dimension_numbers<[1], [0], [0], [1], [0, 0, 1, 1], [], []>} : vector<5x10xf32>, vector<10x220xf32>, vector<5x220xf32> -> vector<5x220xf32>
      %145 = arith.addf %141, %144 : vector<5x220xf32>
      %146 = vector.extract_strided_slice %2 {offsets = [5, 0, 0], sizes = [1, 5, 10], strides = [1, 1, 1]} : vector<9x5x10xf32> to vector<1x5x10xf32>
      %147 = vector.shape_cast %146 : vector<1x5x10xf32> to vector<5x10xf32>
      %cst_62 = arith.constant dense<0.000000e+00> : vector<5x220xf32>
      %148 = tpu.matmul %147, %124, %cst_62 {dimension_numbers = #tpu.dot_dimension_numbers<[1], [0], [0], [1], [0, 0, 1, 1], [], []>} : vector<5x10xf32>, vector<10x220xf32>, vector<5x220xf32> -> vector<5x220xf32>
      %149 = arith.addf %145, %148 : vector<5x220xf32>
      %150 = vector.extract_strided_slice %149 {offsets = [0, 16], sizes = [5, 188], strides = [1, 1]} : vector<5x220xf32> to vector<5x188xf32>
      %151 = arith.addf %138, %150 : vector<5x188xf32>
      %152 = vector.extract_strided_slice %2 {offsets = [6, 0, 0], sizes = [1, 5, 10], strides = [1, 1, 1]} : vector<9x5x10xf32> to vector<1x5x10xf32>
      %153 = vector.shape_cast %152 : vector<1x5x10xf32> to vector<5x10xf32>
      %cst_63 = arith.constant dense<0.000000e+00> : vector<5x220xf32>
      %154 = tpu.matmul %153, %122, %cst_63 {dimension_numbers = #tpu.dot_dimension_numbers<[1], [0], [0], [1], [0, 0, 1, 1], [], []>} : vector<5x10xf32>, vector<10x220xf32>, vector<5x220xf32> -> vector<5x220xf32>
      %155 = vector.extract_strided_slice %2 {offsets = [7, 0, 0], sizes = [1, 5, 10], strides = [1, 1, 1]} : vector<9x5x10xf32> to vector<1x5x10xf32>
      %156 = vector.shape_cast %155 : vector<1x5x10xf32> to vector<5x10xf32>
      %cst_64 = arith.constant dense<0.000000e+00> : vector<5x220xf32>
      %157 = tpu.matmul %156, %123, %cst_64 {dimension_numbers = #tpu.dot_dimension_numbers<[1], [0], [0], [1], [0, 0, 1, 1], [], []>} : vector<5x10xf32>, vector<10x220xf32>, vector<5x220xf32> -> vector<5x220xf32>
      %158 = arith.addf %154, %157 : vector<5x220xf32>
      %159 = vector.extract_strided_slice %2 {offsets = [8, 0, 0], sizes = [1, 5, 10], strides = [1, 1, 1]} : vector<9x5x10xf32> to vector<1x5x10xf32>
      %160 = vector.shape_cast %159 : vector<1x5x10xf32> to vector<5x10xf32>
      %cst_65 = arith.constant dense<0.000000e+00> : vector<5x220xf32>
      %161 = tpu.matmul %160, %124, %cst_65 {dimension_numbers = #tpu.dot_dimension_numbers<[1], [0], [0], [1], [0, 0, 1, 1], [], []>} : vector<5x10xf32>, vector<10x220xf32>, vector<5x220xf32> -> vector<5x220xf32>
      %162 = arith.addf %158, %161 : vector<5x220xf32>
      %163 = vector.extract_strided_slice %162 {offsets = [0, 32], sizes = [5, 188], strides = [1, 1]} : vector<5x220xf32> to vector<5x188xf32>
      %164 = arith.addf %151, %163 : vector<5x188xf32>
      %165 = vector.broadcast %3 : vector<5x1xf32> to vector<5x188xf32>
      %166 = arith.addf %164, %165 : vector<5x188xf32>
      %cst_66 = arith.constant 0.000000e+00 : f32
      %167 = vector.broadcast %cst_66 : f32 to vector<5x188xf32>
      %168 = arith.maximumf %166, %167 : vector<5x188xf32>
      %169 = arith.index_cast %arg12 : i32 to index
      %c0_67 = arith.constant 0 : index
      %c0_68 = arith.constant 0 : index
      %170 = vector.load %arg11[%169, %c0_67, %c0_68] : memref<8x5x188xf32, #tpu.memory_space<vmem>>, vector<1x5x188xf32>
      %171 = vector.shape_cast %170 : vector<1x5x188xf32> to vector<5x188xf32>
      %172 = vector.shape_cast %168 : vector<5x188xf32> to vector<1x5x188xf32>
      tpu.vector_store %arg11[%169, %c0_67, %c0_68], %172 {strides = array<i32>} : memref<8x5x188xf32, #tpu.memory_space<vmem>>, vector<1x5x188xf32>,
    }
    %c8_i32_9 = arith.constant 8 : i32
    %c0_10 = arith.constant 0 : index
    %c0_11 = arith.constant 0 : index
    %c0_12 = arith.constant 0 : index
    %5 = vector.load %arg11[%c0_10, %c0_11, %c0_12] : memref<8x5x188xf32, #tpu.memory_space<vmem>>, vector<8x1x188xf32>
    %6 = vector.shape_cast %5 : vector<8x1x188xf32> to vector<8x188xf32>
    %c0_13 = arith.constant 0 : index
    %c0_14 = arith.constant 0 : index
    %c0_15 = arith.constant 0 : index
    %7 = vector.load %arg6[%c0_13, %c0_14, %c0_15] : memref<5x188x64xf32, #tpu.memory_space<vmem>>, vector<1x188x64xf32>
    %8 = vector.shape_cast %7 : vector<1x188x64xf32> to vector<188x64xf32>
    %cst = arith.constant dense<0.000000e+00> : vector<8x64xf32>
    %9 = tpu.matmul %6, %8, %cst {dimension_numbers = #tpu.dot_dimension_numbers<[1], [0], [0], [1], [0, 0, 1, 1], [], []>} : vector<8x188xf32>, vector<188x64xf32>, vector<8x64xf32> -> vector<8x64xf32>
    %c0_16 = arith.constant 0 : index
    %c1 = arith.constant 1 : index
    %c0_17 = arith.constant 0 : index
    %10 = vector.load %arg11[%c0_16, %c1, %c0_17] : memref<8x5x188xf32, #tpu.memory_space<vmem>>, vector<8x1x188xf32>
    %11 = vector.shape_cast %10 : vector<8x1x188xf32> to vector<8x188xf32>
    %c1_18 = arith.constant 1 : index
    %c0_19 = arith.constant 0 : index
    %c0_20 = arith.constant 0 : index
    %12 = vector.load %arg6[%c1_18, %c0_19, %c0_20] : memref<5x188x64xf32, #tpu.memory_space<vmem>>, vector<1x188x64xf32>
    %13 = vector.shape_cast %12 : vector<1x188x64xf32> to vector<188x64xf32>
    %cst_21 = arith.constant dense<0.000000e+00> : vector<8x64xf32>
    %14 = tpu.matmul %11, %13, %cst_21 {dimension_numbers = #tpu.dot_dimension_numbers<[1], [0], [0], [1], [0, 0, 1, 1], [], []>} : vector<8x188xf32>, vector<188x64xf32>, vector<8x64xf32> -> vector<8x64xf32>
    %c0_22 = arith.constant 0 : index
    %c2 = arith.constant 2 : index
    %c0_23 = arith.constant 0 : index
    %15 = vector.load %arg11[%c0_22, %c2, %c0_23] : memref<8x5x188xf32, #tpu.memory_space<vmem>>, vector<8x1x188xf32>
    %16 = vector.shape_cast %15 : vector<8x1x188xf32> to vector<8x188xf32>
    %c2_24 = arith.constant 2 : index
    %c0_25 = arith.constant 0 : index
    %c0_26 = arith.constant 0 : index
    %17 = vector.load %arg6[%c2_24, %c0_25, %c0_26] : memref<5x188x64xf32, #tpu.memory_space<vmem>>, vector<1x188x64xf32>
    %18 = vector.shape_cast %17 : vector<1x188x64xf32> to vector<188x64xf32>
    %cst_27 = arith.constant dense<0.000000e+00> : vector<8x64xf32>
    %19 = tpu.matmul %16, %18, %cst_27 {dimension_numbers = #tpu.dot_dimension_numbers<[1], [0], [0], [1], [0, 0, 1, 1], [], []>} : vector<8x188xf32>, vector<188x64xf32>, vector<8x64xf32> -> vector<8x64xf32>
    %c0_28 = arith.constant 0 : index
    %c3 = arith.constant 3 : index
    %c0_29 = arith.constant 0 : index
    %20 = vector.load %arg11[%c0_28, %c3, %c0_29] : memref<8x5x188xf32, #tpu.memory_space<vmem>>, vector<8x1x188xf32>
    %21 = vector.shape_cast %20 : vector<8x1x188xf32> to vector<8x188xf32>
    %c3_30 = arith.constant 3 : index
    %c0_31 = arith.constant 0 : index
    %c0_32 = arith.constant 0 : index
    %22 = vector.load %arg6[%c3_30, %c0_31, %c0_32] : memref<5x188x64xf32, #tpu.memory_space<vmem>>, vector<1x188x64xf32>
    %23 = vector.shape_cast %22 : vector<1x188x64xf32> to vector<188x64xf32>
    %cst_33 = arith.constant dense<0.000000e+00> : vector<8x64xf32>
    %24 = tpu.matmul %21, %23, %cst_33 {dimension_numbers = #tpu.dot_dimension_numbers<[1], [0], [0], [1], [0, 0, 1, 1], [], []>} : vector<8x188xf32>, vector<188x64xf32>, vector<8x64xf32> -> vector<8x64xf32>
    %25 = arith.addf %9, %24 : vector<8x64xf32>
    %c0_34 = arith.constant 0 : index
    %c4 = arith.constant 4 : index
    %c0_35 = arith.constant 0 : index
    %26 = vector.load %arg11[%c0_34, %c4, %c0_35] : memref<8x5x188xf32, #tpu.memory_space<vmem>>, vector<8x1x188xf32>
    %27 = vector.shape_cast %26 : vector<8x1x188xf32> to vector<8x188xf32>
    %c4_36 = arith.constant 4 : index
    %c0_37 = arith.constant 0 : index
    %c0_38 = arith.constant 0 : index
    %28 = vector.load %arg6[%c4_36, %c0_37, %c0_38] : memref<5x188x64xf32, #tpu.memory_space<vmem>>, vector<1x188x64xf32>
    %29 = vector.shape_cast %28 : vector<1x188x64xf32> to vector<188x64xf32>
    %cst_39 = arith.constant dense<0.000000e+00> : vector<8x64xf32>
    %30 = tpu.matmul %27, %29, %cst_39 {dimension_numbers = #tpu.dot_dimension_numbers<[1], [0], [0], [1], [0, 0, 1, 1], [], []>} : vector<8x188xf32>, vector<188x64xf32>, vector<8x64xf32> -> vector<8x64xf32>
    %31 = arith.addf %14, %30 : vector<8x64xf32>
    %32 = arith.addf %25, %31 : vector<8x64xf32>
    %33 = arith.addf %32, %19 : vector<8x64xf32>
    %c0_40 = arith.constant 0 : index
    %c0_41 = arith.constant 0 : index
    %34 = vector.load %arg7[%c0_40, %c0_41] : memref<1x64xf32, #tpu.memory_space<vmem>>, vector<1x64xf32>
    %35 = vector.broadcast %34 : vector<1x64xf32> to vector<8x64xf32>
    %36 = arith.addf %33, %35 : vector<8x64xf32>
    %cst_42 = arith.constant 0.000000e+00 : f32
    %37 = vector.broadcast %cst_42 : f32 to vector<8x64xf32>
    %38 = arith.maximumf %36, %37 : vector<8x64xf32>
    %c0_43 = arith.constant 0 : index
    %c0_44 = arith.constant 0 : index
    %39 = vector.load %arg8[%c0_43, %c0_44] : memref<64x2xf32, #tpu.memory_space<vmem>>, vector<64x2xf32>
    %cst_45 = arith.constant dense<0.000000e+00> : vector<8x2xf32>
    %40 = tpu.matmul %38, %39, %cst_45 {dimension_numbers = #tpu.dot_dimension_numbers<[1], [0], [0], [1], [0, 0, 1, 1], [], []>} : vector<8x64xf32>, vector<64x2xf32>, vector<8x2xf32> -> vector<8x2xf32>
    %c0_46 = arith.constant 0 : index
    %c0_47 = arith.constant 0 : index
    %41 = vector.load %arg9[%c0_46, %c0_47] : memref<1x2xf32, #tpu.memory_space<vmem>>, vector<1x2xf32>
    %42 = vector.broadcast %41 : vector<1x2xf32> to vector<8x2xf32>
    %43 = arith.addf %40, %42 : vector<8x2xf32>
    %cst_48 = arith.constant dense<0xFF800000> : vector<8xf32>
    %44 = vector.multi_reduction <maximumf>, %43, %cst_48 [1] : vector<8x2xf32> to vector<8xf32>
    %45 = vector.shape_cast %44 : vector<8xf32> to vector<8x1xf32>
    %46 = vector.broadcast %45 : vector<8x1xf32> to vector<8x2xf32>
    %47 = arith.subf %43, %46 : vector<8x2xf32>
    %48 = math.exp %47 : vector<8x2xf32>
    %cst_49 = arith.constant dense<0.000000e+00> : vector<8xf32>
    %49 = vector.multi_reduction <add>, %48, %cst_49 [1] : vector<8x2xf32> to vector<8xf32>
    %50 = vector.shape_cast %49 : vector<8xf32> to vector<8x1xf32>
    %51 = vector.broadcast %50 : vector<8x1xf32> to vector<8x2xf32>
    %52 = arith.divf %48, %51 : vector<8x2xf32>
    %c0_50 = arith.constant 0 : index
    %c0_51 = arith.constant 0 : index
    %53 = vector.load %arg10[%c0_50, %c0_51] : memref<8x2xf32, #tpu.memory_space<vmem>>, vector<8x2xf32>
    tpu.vector_store %arg10[%c0_50, %c0_51], %52 {strides = array<i32>} : memref<8x2xf32, #tpu.memory_space<vmem>>, vector<8x2xf32>,
    return
  }
  func.func @transform_0(%arg0: i32) -> (i32, i32, i32) {
    %c0_i32 = arith.constant 0 : i32
    %c0_i32_0 = arith.constant 0 : i32
    %c0_i32_1 = arith.constant 0 : i32
    return %arg0, %c0_i32, %c0_i32_0 : i32, i32, i32
  }
  func.func @transform_1(%arg0: i32) -> (i32, i32, i32) {
    %c0_i32 = arith.constant 0 : i32
    %c0_i32_0 = arith.constant 0 : i32
    %c0_i32_1 = arith.constant 0 : i32
    %c0_i32_2 = arith.constant 0 : i32
    return %c0_i32, %c0_i32_0, %c0_i32_1 : i32, i32, i32
  }
  func.func @transform_2(%arg0: i32) -> (i32, i32) {
    %c0_i32 = arith.constant 0 : i32
    %c0_i32_0 = arith.constant 0 : i32
    %c0_i32_1 = arith.constant 0 : i32
    return %c0_i32, %c0_i32_0 : i32, i32
  }
  func.func @transform_3(%arg0: i32) -> (i32, i32, i32) {
    %c0_i32 = arith.constant 0 : i32
    %c0_i32_0 = arith.constant 0 : i32
    %c0_i32_1 = arith.constant 0 : i32
    %c0_i32_2 = arith.constant 0 : i32
    return %c0_i32, %c0_i32_0, %c0_i32_1 : i32, i32, i32
  }
  func.func @transform_4(%arg0: i32) -> (i32, i32) {
    %c0_i32 = arith.constant 0 : i32
    %c0_i32_0 = arith.constant 0 : i32
    %c0_i32_1 = arith.constant 0 : i32
    return %c0_i32, %c0_i32_0 : i32, i32
  }
  func.func @transform_5(%arg0: i32) -> (i32, i32, i32) {
    %c0_i32 = arith.constant 0 : i32
    %c0_i32_0 = arith.constant 0 : i32
    %c0_i32_1 = arith.constant 0 : i32
    %c0_i32_2 = arith.constant 0 : i32
    return %c0_i32, %c0_i32_0, %c0_i32_1 : i32, i32, i32
  }
  func.func @transform_6(%arg0: i32) -> (i32, i32) {
    %c0_i32 = arith.constant 0 : i32
    %c0_i32_0 = arith.constant 0 : i32
    %c0_i32_1 = arith.constant 0 : i32
    return %c0_i32, %c0_i32_0 : i32, i32
  }
  func.func @transform_7(%arg0: i32) -> (i32, i32) {
    %c0_i32 = arith.constant 0 : i32
    %c0_i32_0 = arith.constant 0 : i32
    %c0_i32_1 = arith.constant 0 : i32
    return %c0_i32, %c0_i32_0 : i32, i32
  }
  func.func @transform_8(%arg0: i32) -> (i32, i32) {
    %c0_i32 = arith.constant 0 : i32
    %c0_i32_0 = arith.constant 0 : i32
    %c0_i32_1 = arith.constant 0 : i32
    return %c0_i32, %c0_i32_0 : i32, i32
  }
  func.func @transform_9(%arg0: i32) -> (i32, i32) {
    %c0_i32 = arith.constant 0 : i32
    %c0_i32_0 = arith.constant 0 : i32
    return %arg0, %c0_i32 : i32, i32
  }
}

</mosaic_0001>

<bundles_post_ra>
// kernel: actor_cnn_forward.1
= control target key start
LH: loop header
LB: loop body
LE: loop exit
PB: predicated region body
PF: predicated region fallthrough
CT: control target
= control target key end

     0   :  { %s2650_s25 = smov 0   ;;  %s3472_s0 = inlined_call_operand.vmem [shape: f32[8,1,256], index: 0, kind: input, shape index: {}]   ;;  %s3473_s1 = inlined_call_operand.vmem [shape: f32[9,10,1], index: 1, kind: input, shape index: {}]   ;;  %s3474_s5 = inlined_call_operand.vmem [shape: f32[5,188,64], index: 5, kind: input, shape index: {}]   ;;  %s3475_s6 = inlined_call_operand.vmem [shape: f32[1,64], index: 6, kind: input, shape index: {}]   ;;  %s3476_s7 = inlined_call_operand.vmem [shape: f32[64,2], index: 7, kind: input, shape index: {}]   ;;  %s3477_s8 = inlined_call_operand.vmem [shape: f32[1,2], index: 8, kind: input, shape index: {}]   ;;  %s3478_s9 = inlined_call_operand.vmem [shape: f32[8,2], index: 9, kind: output, shape index: {}]   ;;  %s3479_s2 = inlined_call_operand.vmem [shape: f32[10,1], index: 2, kind: input, shape index: {}]   ;;  %s3480_s3 = inlined_call_operand.vmem [shape: f32[9,5,10], index: 3, kind: input, shape index: {}]   ;;  %s3481_s4 = inlined_call_operand.vmem [shape: f32[5,1], index: 4, kind: input, shape index: {}]  }
   0x1   :  { %v2503_v0 = vld [vmem:[%s3473_s1] sm:$0xff]  ;;  %v2508_v1 = vld [vmem:[%s3473_s1 + $0x8] sm:$0x3]  ;;  %v2513_v2 = vld [vmem:[%s3473_s1 + $0x10] sm:$0xff] }
   0x2   :  { %v2518_v3 = vld [vmem:[%s3473_s1 + $0x18] sm:$0x3]  ;;  %v2523_v4 = vld [vmem:[%s3473_s1 + $0x20] sm:$0xff]  ;;  %v2528_v5 = vld [vmem:[%s3473_s1 + $0x28] sm:$0x3] }
   0x3   :  { %v2533_v6 = vld [vmem:[%s3473_s1 + $0x30] sm:$0xff]  ;;  %v2538_v7 = vld [vmem:[%s3473_s1 + $0x38] sm:$0x3]  ;;  %v2543_v8 = vld [vmem:[%s3473_s1 + $0x40] sm:$0xff] }
   0x4   :  { %v2548_v9 = vld [vmem:[%s3473_s1 + $0x48] sm:$0x3]  ;;  %v2553_v10 = vld [vmem:[%s3473_s1 + $0x50] sm:$0xff]  ;;  %v2558_v11 = vld [vmem:[%s3473_s1 + $0x58] sm:$0x3] }
   0x5   :  { %v2563_v12 = vld [vmem:[%s3473_s1 + $0x60] sm:$0xff]  ;;  %v2568_v13 = vld [vmem:[%s3473_s1 + $0x68] sm:$0x3]  ;;  %v2573_v14 = vld [vmem:[%s3473_s1 + $0x70] sm:$0xff] }
   0x6   :  { %v2578_v15 = vld [vmem:[%s3473_s1 + $0x78] sm:$0x3]  ;;  %v2583_v16 = vld [vmem:[%s3473_s1 + $0x80] sm:$0xff]  ;;  %v2588_v17 = vld [vmem:[%s3473_s1 + $0x88] sm:$0x3] }
   0x7   :  { %v2593_v18 = vld [vmem:[%s3479_s2] sm:$0xff]  ;;  %v2598_v19 = vld [vmem:[%s3479_s2 + $0x8] sm:$0x3]  ;;  %v2613_v22 = vld [vmem:[%s3480_s3 + $0x10] sm:$0x1f] }
   0x8   :  { %v2603_v20 = vld [vmem:[%s3480_s3] sm:$0x1f]  ;;  %v2608_v21 = vld [vmem:[%s3480_s3 + $0x8] sm:$0x1f]  ;;  %v2618_v23 = vld [vmem:[%s3480_s3 + $0x18] sm:$0x1f] }
   0x9   :  { %v2623_v24 = vld [vmem:[%s3480_s3 + $0x20] sm:$0x1f]  ;;  %v2628_v25 = vld [vmem:[%s3480_s3 + $0x28] sm:$0x1f]  ;;  %v2633_v26 = vld [vmem:[%s3480_s3 + $0x30] sm:$0x1f] }
   0xa   :  { %v2638_v27 = vld [vmem:[%s3480_s3 + $0x38] sm:$0x1f]  ;;  %v2643_v28 = vld [vmem:[%s3480_s3 + $0x40] sm:$0x1f] }
   0xb   :  { %v2648_v29 = vld [vmem:[%s3481_s4] sm:$0x1f] }
   0xc LB: > { %v2441_v30 = vmov 0   ;;  %v82_v31 = vlaneseq  ;;  %s2243_s3 = sshll.u32 %s2439_s25, 1  ;;  %s2442_s28 = smov 127   ;;  %vm122_vm0 = vcmask 1039360   ;;  %vm159_vm1 = vcmask 1031168   ;;  %s2439_s25 = sphi %s2650_s25, %s67_s25  }
   0xd   : > { %2428 = vset.pattern.permute.xlu1 %v2441_v30  ;;  %2427 = vset.pattern.permute.xlu0 %v2441_v30  ;;  %s69_s27 = scalar_lea.vmem %s3472_s0, %s2243_s3  ;;  %s2443_s29 = smov 126   ;;  %vm272_vm2 = vcmask 916480   ;;  %vm381_vm3 = vcmask 785408   ;;  %vm430_vm4 = vcmask 1041408   ;;  %vm426_vm5 = vcmask 80896  }
   0xe   : > { %231 = vperm.xlu1 %2428, %v2558_v11   ;;  %195 = vperm.xlu0 %2427, %v2548_v9   ;;  %v2672_v32 = vshrl.u32 %v82_v31, 7  ;;  %v70_v35 = vld [vmem:[%s69_s27] sm:$0x3]  ;;  %s2444_s30 = smov 112   ;;  %s2445_s10 = smov 96   ;;  %vm1160_vm6 = vcmask 487424  }
   0xf   : > { %s2381_s1 = sshll.u32 %s2439_s25, 4  ;;  %s67_s25 = sadd.s32 1, %s2439_s25  }
  0x10   : > { %v84_v33 = vsub.s32 0, %v2672_v32  ;;  %v88_v34 = vsub.s32 1, %v2672_v32  ;;  %s1158_s11 = scalar_lea.vmem [#allocation2], %s2381_s1  ;;  %p64_p0 = scmp.ge.s32.totalorder %s67_s25, 8  }
  0x11   :  { %vm1358_vm7 = vcmask (%p64_p0), 490496   ;;  %vm1361_vm8 = vcmask (%p64_p0), 1043456   ;;  %vm2449_vm9 = vmmov (%p64_p0), 0   ;;  %vm2143_vm10 = vcmask (%p64_p0), 523264  }
  0x12   : > { %304 = vperm.xlu1 %2428, %v2578_v15   ;;  %190 = vperm.xlu0 %2427, %v2543_v8   ;;  %v2679_v36 = vrot.slane %v70_v35, %v84_v33  ;;  %v2681_v37 = vrot.slane %v70_v35, %v88_v34  ;;  %v2305_v8 = vld [vmem:[%s3474_s5 + $0x1c8] sm:$0xff] (%p64_p0)  ;;  %vm2217_vm11 = vcmask (%p64_p0), 15360  }
  0x16   : > { %299 = vperm.xlu1 %2428, %v2573_v14   ;;  %226 = vperm.xlu0 %2427, %v2553_v10  }
  0x1a   : > { %335 = vperm.xlu1 %2428, %v2583_v16   ;;  %340 = vperm.xlu0 %2427, %v2588_v17  }
  0x1e   : > { %181 = vperm.xlu1 %2428, %v2538_v7   ;;  %103 = vperm.xlu0 %2427, %v2518_v3   ;;  %v2307_v3 = vld [vmem:[%s3474_s5 + $0x1d8] sm:$0xff] (%p64_p0) }
  0x22   : > { %140 = vperm.xlu1 %2428, %v2528_v5   ;;  %98 = vperm.xlu0 %2427, %v2513_v2   ;;  %v2308_v2 = vld [vmem:[%s3474_s5 + $0x1e0] sm:$0xff] (%p64_p0) }
  0x26   : > { %290 = vperm.xlu1 %2428, %v2568_v13   ;;  %176 = vperm.xlu0 %2427, %v2533_v6  }
  0x2a   : > { %285 = vperm.xlu1 %2428, %v2563_v12   ;;  %135 = vperm.xlu0 %2427, %v2523_v4   ;;  %v2306_v4 = vld [vmem:[%s3474_s5 + $0x1d0] sm:$0xff] (%p64_p0) }
  0x89   : > { %v196_v38 = vpop.permute.xlu0 %195  ;;  %v232_v44 = vpop.permute.xlu1 %231 }
  0x8a   : > { %v200_v39 = vmul.f32 %v196_v38, %v2679_v36  ;;  %v201_v40 = vmul.f32 %v196_v38, %v2681_v37  ;;  %v236_v45 = vmul.f32 %v232_v44, %v2679_v36  ;;  %v237_v46 = vmul.f32 %v232_v44, %v2681_v37 }
  0x8c   : > { %212 = vrot.lane.b32.xlu1 %v201_v40, %s2442_s28  ;;  %210 = vrot.lane.b32.xlu0 %v200_v39, %s2442_s28 }
  0x8d   : > { %v191_v41 = vpop.permute.xlu0 %190  ;;  %v305_v47 = vpop.permute.xlu1 %304 }
  0x8e   : > { %v198_v42 = vmul.f32 %v191_v41, %v2679_v36  ;;  %v199_v43 = vmul.f32 %v191_v41, %v2681_v37  ;;  %v309_v48 = vmul.f32 %v305_v47, %v2679_v36  ;;  %v310_v49 = vmul.f32 %v305_v47, %v2681_v37 }
  0x90   : > { %208 = vrot.lane.b32.xlu1 %v199_v43, %s2442_s28  ;;  %206 = vrot.lane.b32.xlu0 %v198_v42, %s2442_s28 }
  0x91   : > { %v227_v50 = vpop.permute.xlu0 %226  ;;  %v300_v53 = vpop.permute.xlu1 %299 }
  0x92   : > { %v234_v51 = vmul.f32 %v227_v50, %v2679_v36  ;;  %v235_v52 = vmul.f32 %v227_v50, %v2681_v37  ;;  %v307_v54 = vmul.f32 %v300_v53, %v2679_v36  ;;  %v308_v55 = vmul.f32 %v300_v53, %v2681_v37 }
  0x94   : > { %248 = vrot.lane.b32.xlu1 %v237_v46, %s2443_s29  ;;  %246 = vrot.lane.b32.xlu0 %v236_v45, %s2443_s29 }
  0x95   : > { %v341_v56 = vpop.permute.xlu0 %340  ;;  %v336_v59 = vpop.permute.xlu1 %335 }
  0x96   : > { %v345_v57 = vmul.f32 %v341_v56, %v2679_v36  ;;  %v346_v58 = vmul.f32 %v341_v56, %v2681_v37  ;;  %v343_v60 = vmul.f32 %v336_v59, %v2679_v36  ;;  %v344_v61 = vmul.f32 %v336_v59, %v2681_v37 }
  0x98   : > { %321 = vrot.lane.b32.xlu1 %v310_v49, %s2442_s28  ;;  %319 = vrot.lane.b32.xlu0 %v309_v48, %s2442_s28 }
  0x99   : > { %v104_v62 = vpop.permute.xlu0 %103  ;;  %v182_v30 = vpop.permute.xlu1 %181 }
  0x9a   : > { %v108_v31 = vmul.f32 %v104_v62, %v2679_v36  ;;  %v109_v33 = vmul.f32 %v104_v62, %v2681_v37 }
  0x9c   : > { %244 = vrot.lane.b32.xlu1 %v235_v52, %s2443_s29  ;;  %242 = vrot.lane.b32.xlu0 %v234_v51, %s2443_s29  ;;  %v187_v51 = vmul.f32 %v182_v30, %v2681_v37 }
  0x9d   : > { %v99_v63 = vpop.permute.xlu0 %98  ;;  %v141_v39 = vpop.permute.xlu1 %140 }
  0x9e   : > { %v106_v35 = vmul.f32 %v99_v63, %v2679_v36  ;;  %v107_v38 = vmul.f32 %v99_v63, %v2681_v37  ;;  %v145_v40 = vmul.f32 %v141_v39, %v2679_v36  ;;  %v146_v41 = vmul.f32 %v141_v39, %v2681_v37 }
  0xa0   : > { %317 = vrot.lane.b32.xlu1 %v308_v55, %s2442_s28  ;;  %315 = vrot.lane.b32.xlu0 %v307_v54, %s2442_s28 }
  0xa1   : > { %v177_v34 = vpop.permute.xlu0 %176  ;;  %v291_v45 = vpop.permute.xlu1 %290 }
  0xa4   : > { %357 = vrot.lane.b32.xlu1 %v346_v58, %s2443_s29  ;;  %355 = vrot.lane.b32.xlu0 %v345_v57, %s2443_s29  ;;  %v185_v58 = vmul.f32 %v177_v34, %v2681_v37 }
  0xa5   : > { %v136_v42 = vpop.permute.xlu0 %135  ;;  %v286_v46 = vpop.permute.xlu1 %285 }
  0xa6   : > { %v143_v43 = vmul.f32 %v136_v42, %v2679_v36  ;;  %v144_v44 = vmul.f32 %v136_v42, %v2681_v37 }
  0xa8   : > { %353 = vrot.lane.b32.xlu1 %v344_v61, %s2443_s29  ;;  %351 = vrot.lane.b32.xlu0 %v343_v60, %s2443_s29  ;;  %v184_v60 = vmul.f32 %v177_v34, %v2679_v36  ;;  %v295_v34 = vmul.f32 %v291_v45, %v2679_v36 }
  0xac   : > { %73 = vperm.xlu1 %2428, %v2503_v0   ;;  %78 = vperm.xlu0 %2427, %v2508_v1   ;;  %v2309_v0 = vld [vmem:[%s3474_s5 + $0x1e8] sm:$0xff] (%p64_p0) }
  0xb0   : > { %394 = vperm.xlu1 %2428, %v2593_v18   ;;  %399 = vperm.xlu0 %2427, %v2598_v19  }
  0xb4   : > { %120 = vrot.lane.b32.xlu1 %v109_v33, %s2442_s28  ;;  %118 = vrot.lane.b32.xlu0 %v108_v31, %s2442_s28 }
  0xb8   : > { %116 = vrot.lane.b32.xlu1 %v107_v38, %s2442_s28  ;;  %114 = vrot.lane.b32.xlu0 %v106_v35, %s2442_s28 }
  0xbc   : > { %157 = vrot.lane.b32.xlu1 %v146_v41, %s2443_s29  ;;  %155 = vrot.lane.b32.xlu0 %v145_v40, %s2443_s29  ;;  %v296_v41 = vmul.f32 %v291_v45, %v2681_v37 }
  0xc0   : > { %153 = vrot.lane.b32.xlu1 %v144_v44, %s2443_s29  ;;  %151 = vrot.lane.b32.xlu0 %v143_v43, %s2443_s29 }
  0xfe   : > { %v213_v47 = vpop.permute.xlu1 %212  ;;  %v211_v48 = vpop.permute.xlu0 %210 }
  0xff   : > { %v223_v52 = vadd.f32 %v213_v47, %v187_v51  ;;  %v215_v44 = vsel %vm122_vm0, %v211_v48, %v213_v47 }
 0x102   : > { %v209_v49 = vpop.permute.xlu1 %208  ;;  %v207_v50 = vpop.permute.xlu0 %206 }
 0x103   : > { %v214_v59 = vsel %vm122_vm0, %v207_v50, %v209_v49  ;;  %v221_v61 = vadd.f32 %v209_v49, %v185_v58 }
 0x104   : > { %v220_v62 = vadd.f32 %v214_v59, %v184_v60 }
 0x106   : > { %v249_v53 = vpop.permute.xlu1 %248  ;;  %v247_v54 = vpop.permute.xlu0 %246 }
 0x107   : > { %v259_v55 = vadd.f32 %v249_v53, %v223_v52  ;;  %v186_v52 = vmul.f32 %v182_v30, %v2679_v36  ;;  %v251_v60 = vsel %vm159_vm1, %v247_v54, %v249_v53  ;;  %v293_v30 = vmul.f32 %v286_v46, %v2679_v36 }
 0x109   : > { %270 = vrot.lane.b32.xlu1 %v259_v55, %s2444_s30  ;;  %v294_v55 = vmul.f32 %v286_v46, %v2681_v37 }
 0x10a   : > { %v322_v56 = vpop.permute.xlu1 %321  ;;  %v320_v57 = vpop.permute.xlu0 %319 }
 0x10b   : > { %v324_v42 = vsel %vm122_vm0, %v320_v57, %v322_v56  ;;  %v332_v43 = vadd.f32 %v322_v56, %v296_v41 }
 0x10c   : > { %v331_v49 = vadd.f32 %v324_v42, %v295_v34 }
 0x10e   : > { %v245_v63 = vpop.permute.xlu1 %244  ;;  %v243_v31 = vpop.permute.xlu0 %242 }
 0x10f   : > { %v257_v33 = vadd.f32 %v245_v63, %v221_v61  ;;  %v250_v35 = vsel %vm159_vm1, %v243_v31, %v245_v63 }
 0x110   : > { %v256_v38 = vadd.f32 %v250_v35, %v220_v62  ;;  %v222_v62 = vadd.f32 %v215_v44, %v186_v52 }
 0x111   : > { %266 = vrot.lane.b32.xlu0 %v257_v33, %s2444_s30 }
 0x112   : > { %v318_v39 = vpop.permute.xlu1 %317  ;;  %v316_v40 = vpop.permute.xlu0 %315  ;;  %264 = vrot.lane.b32.xlu1 %v256_v38, %s2444_s30  ;;  %v258_v56 = vadd.f32 %v251_v60, %v222_v62 }
 0x113   : > { %v330_v57 = vadd.f32 %v318_v39, %v294_v55  ;;  %v323_v45 = vsel %vm122_vm0, %v316_v40, %v318_v39 }
 0x114   : > { %v329_v33 = vadd.f32 %v323_v45, %v293_v30 }
 0x116   : > { %v358_v50 = vpop.permute.xlu1 %357  ;;  %v356_v51 = vpop.permute.xlu0 %355 }
 0x117   : > { %v368_v58 = vadd.f32 %v358_v50, %v332_v43  ;;  %v360_v59 = vsel %vm159_vm1, %v356_v51, %v358_v50 }
 0x118   : > { %v367_v61 = vadd.f32 %v360_v59, %v331_v49 }
 0x119   : > { %379 = vrot.lane.b32.xlu0 %v368_v58, %s2445_s10 }
 0x11a   : > { %v354_v47 = vpop.permute.xlu1 %353  ;;  %v352_v48 = vpop.permute.xlu0 %351  ;;  %377 = vrot.lane.b32.xlu1 %v367_v61, %s2445_s10 }
 0x11b   : > { %v366_v63 = vadd.f32 %v354_v47, %v330_v57  ;;  %v359_v31 = vsel %vm159_vm1, %v352_v48, %v354_v47 }
 0x11c   : > { %v365_v53 = vadd.f32 %v359_v31, %v329_v33  ;;  %v2446_v31 = vmov 0.0  }
 0x11d   : > { %268 = vrot.lane.b32.xlu0 %v258_v56, %s2444_s30  ;;  %577 = vmatprep.mubr.f32.mxu1 %v2446_v31 }
 0x11e   : > { %375 = vrot.lane.b32.xlu1 %v366_v63, %s2445_s10  ;;  %499 = vmatprep.mubr.f32.mxu0 %v2446_v31 }
 0x121   : > { %373 = vrot.lane.b32.xlu0 %v365_v53, %s2445_s10 }
 0x127   : > { %v74_v54 = vpop.permute.xlu1 %73  ;;  %v79_v35 = vpop.permute.xlu0 %78 }
 0x128   : > { %v95_v50 = vmul.f32 %v2681_v37, %v79_v35  ;;  %v93_v60 = vmul.f32 %v2681_v37, %v74_v54  ;;  %v94_v57 = vmul.f32 %v2679_v36, %v79_v35  ;;  %v92_v37 = vmul.f32 %v2679_v36, %v74_v54 }
 0x12b   : > { %v395_v38 = vpop.permute.xlu1 %394  ;;  %v400_v39 = vpop.permute.xlu0 %399 }
 0x12f   : > { %v121_v40 = vpop.permute.xlu1 %120  ;;  %v119_v41 = vpop.permute.xlu0 %118 }
 0x130   : > { %v132_v52 = vadd.f32 %v121_v40, %v95_v50  ;;  %v124_v61 = vsel %vm122_vm0, %v119_v41, %v121_v40 }
 0x131   : > { %v131_v33 = vadd.f32 %v124_v61, %v94_v57 }
 0x133   : > { %v117_v42 = vpop.permute.xlu1 %116  ;;  %v115_v46 = vpop.permute.xlu0 %114 }
 0x134   : > { %v130_v45 = vadd.f32 %v117_v42, %v93_v60  ;;  %v123_v48 = vsel %vm122_vm0, %v115_v46, %v117_v42 }
 0x135   : > { %v129_v41 = vadd.f32 %v123_v48, %v92_v37 }
 0x137   : > { %v158_v34 = vpop.permute.xlu1 %157  ;;  %v156_v43 = vpop.permute.xlu0 %155 }
 0x138   : > { %v169_v58 = vadd.f32 %v158_v34, %v132_v52  ;;  %v161_v30 = vsel %vm159_vm1, %v156_v43, %v158_v34 }
 0x139   : > { %v168_v42 = vadd.f32 %v161_v30, %v131_v33 }
 0x13b   : > { %v154_v44 = vpop.permute.xlu1 %153  ;;  %v152_v49 = vpop.permute.xlu0 %151 }
 0x13c   : > { %v167_v53 = vadd.f32 %v154_v44, %v130_v45  ;;  %v160_v35 = vsel %vm159_vm1, %v152_v49, %v154_v44 }
 0x13d   : > { %v166_v36 = vadd.f32 %v160_v35, %v129_v41 }
 0x17b   : > { %v271_v51 = vpop.permute.xlu1 %270 }
 0x17c   : > { %v282_v62 = vadd.f32 %v271_v51, %v169_v58 }
 0x183   : > { %v267_v55 = vpop.permute.xlu0 %266 }
 0x184   : > { %v265_v59 = vpop.permute.xlu1 %264  ;;  %v280_v46 = vadd.f32 %v267_v55, %v167_v53 }
 0x185   : > { %v273_v43 = vsel %vm272_vm2, %v265_v59, %v267_v55 }
 0x186   : > { %v279_v44 = vadd.f32 %v273_v43, %v166_v36 }
 0x18b   : > { %v380_v47 = vpop.permute.xlu0 %379 }
 0x18c   : > { %v391_v56 = vadd.f32 %v380_v47, %v282_v62  ;;  %v378_v63 = vpop.permute.xlu1 %377 }
 0x18d   : > { %v383_v61 = vsel %vm381_vm3, %v378_v63, %v380_v47 }
 0x18e   : > { %v405_v40 = vadd.f32 %v400_v39, %v391_v56 }
 0x18f   : > { %v269_v34 = vpop.permute.xlu0 %268 }
 0x190   : > { %v2770_v50 = vmax.f32 %v405_v40, 0.0  ;;  %v274_v52 = vsel %vm272_vm2, %v269_v34, %v271_v51  ;;  %v376_v58 = vpop.permute.xlu1 %375 }
 0x191   : > { %v281_v54 = vadd.f32 %v274_v52, %v168_v42  ;;  %v389_v60 = vadd.f32 %v376_v58, %v280_v46 }
 0x192   : > { %420 = vrot.lane.b32.xlu1 %v2770_v50, %s2442_s28  ;;  %2247 = vmatprep.subr.msk.mxu1 %vm430_vm4, %v2770_v50 }
 0x193   : > { %v390_v49 = vadd.f32 %v383_v61, %v281_v54  ;;  %v403_v62 = vadd.f32 %v395_v38, %v389_v60  ;;  %v374_v55 = vpop.permute.xlu0 %373 }
 0x194   : > { %v382_v59 = vsel %vm381_vm3, %v374_v55, %v376_v58 }
 0x195   : > { %v404_v57 = vadd.f32 %v400_v39, %v390_v49  ;;  %v407_v51 = vmax.f32 %v403_v62, 0.0  ;;  %v388_v45 = vadd.f32 %v382_v59, %v279_v44 }
 0x197   : > { %v408_v48 = vmax.f32 %v404_v57, 0.0  ;;  %v402_v30 = vadd.f32 %v395_v38, %v388_v45  ;;  %416 = vrot.lane.b32.xlu1 %v407_v51, %s2442_s28 }
 0x199   : > { %v406_v47 = vmax.f32 %v402_v30, 0.0  ;;  %418 = vrot.lane.b32.xlu0 %v408_v48, %s2442_s28  ;;  %2248 = vmatpush1.msk.msra.mxu1 %vm430_vm4, %v408_v48 }
 0x19a   : > { %543 = vmatprep.subr.mxu1 %v407_v51 }
 0x19b   : > { %590 = vrot.lane.b32.xlu1 %v2770_v50, %s2443_s29  ;;  %544 = vmatpush1.msra.mxu1 %v406_v47 }
 0x19c   : > { %2249 = vmatmul.mubr.msk.f32.vlgmr.msra.gmra.mxu1 %vm426_vm5, %v2603_v20 }
 0x19d   : > { %414 = vrot.lane.b32.xlu0 %v406_v47, %s2442_s28  ;;  %745 = vmatprep.mubr.f32.mxu1 %v2446_v31 }
 0x19f   : > { %586 = vrot.lane.b32.xlu1 %v407_v51, %s2443_s29 }
 0x1a1   : > { %588 = vrot.lane.b32.xlu0 %v408_v48, %s2443_s29 }
 0x1a5   : > { %584 = vrot.lane.b32.xlu0 %v406_v47, %s2443_s29 }
 0x1a9   : > { %1150 = vperm.xlu0 %2427, %v2648_v29  }
 0x204   : > { %v421_v38 = vpop.permute.xlu1 %420 }
 0x205   : > { %2244 = vmatprep.subr.msk.mxu0 %vm430_vm4, %v421_v38  ;;  %2253 = vmatprep.subr.msk.mxu1 %vm430_vm4, %v421_v38 }
 0x209   : > { %v417_v39 = vpop.permute.xlu1 %416 }
 0x20b   : > { %v419_v56 = vpop.permute.xlu0 %418 }
 0x20c   : > { %v423_v63 = vsel %vm122_vm0, %v419_v56, %v421_v38 }
 0x20d   : > { %2245 = vmatpush1.msk.msra.mxu0 %vm430_vm4, %v423_v63  ;;  %2254 = vmatpush1.msk.msra.mxu1 %vm430_vm4, %v423_v63  ;;  %v591_v37 = vpop.permute.xlu1 %590 }
 0x20e   : > { %465 = vmatprep.subr.mxu0 %v417_v39  ;;  %711 = vmatprep.subr.mxu1 %v417_v39 }
 0x20f   : > { %v415_v33 = vpop.permute.xlu0 %414 }
 0x210   : > { %v422_v53 = vsel %vm122_vm0, %v415_v33, %v417_v39 }
 0x211   : > { %466 = vmatpush1.msra.mxu0 %v422_v53  ;;  %712 = vmatpush1.msra.mxu1 %v422_v53  ;;  %v587_v41 = vpop.permute.xlu1 %586 }
 0x212   : > { %2250 = vmatprep.subr.msk.mxu0 %vm430_vm4, %v591_v37  ;;  %2259 = vmatprep.subr.msk.mxu1 %vm430_vm4, %v591_v37 }
 0x213   : > { %v589_v35 = vpop.permute.xlu0 %588  ;;  %2246 = vmatmul.mubr.msk.f32.vlgmr.msra.gmra.mxu0 %vm426_vm5, %v2608_v21  ;;  %2255 = vmatmul.mubr.msk.f32.vlgmr.msra.gmra.mxu1 %vm426_vm5, %v2623_v24  ;;  %v2337_v21 = vld [vmem:[%s3474_s5 + $0x2b8] sm:$0xff] (%p64_p0) }
 0x214   : > { %v593_v40 = vsel %vm159_vm1, %v589_v35, %v591_v37  ;;  %667 = vmatprep.mubr.f32.mxu0 %v2446_v31  ;;  %893 = vmatprep.mubr.f32.mxu1 %v2446_v31 }
 0x215   : > { %2251 = vmatpush1.msk.msra.mxu0 %vm430_vm4, %v593_v40  ;;  %2260 = vmatpush1.msk.msra.mxu1 %vm430_vm4, %v593_v40 }
 0x216   : > { %633 = vmatprep.subr.mxu0 %v587_v41  ;;  %859 = vmatprep.subr.mxu1 %v587_v41 }
 0x217   : > { %v585_v42 = vpop.permute.xlu0 %584 }
 0x218   : > { %v592_v46 = vsel %vm159_vm1, %v585_v42, %v587_v41 }
 0x219   : > { %634 = vmatpush1.msra.mxu0 %v592_v46  ;;  %860 = vmatpush1.msra.mxu1 %v592_v46 }
 0x21a   : > { %2252 = vmatmul.mubr.msk.f32.vlgmr.msra.gmra.mxu0 %vm426_vm5, %v2613_v22  ;;  %2256 = vmatprep.subr.msk.mxu0 %vm430_vm4, %v2770_v50  ;;  %v2336_v22 = vld [vmem:[%s3474_s5 + $0x2b0] sm:$0xff] (%p64_p0) }
 0x21b   : > { %2265 = vmatprep.subr.msk.mxu1 %vm430_vm4, %v2770_v50  ;;  %2257 = vmatpush1.msk.msra.mxu0 %vm430_vm4, %v408_v48 }
 0x21c   : > { %2261 = vmatmul.mubr.msk.f32.vlgmr.msra.gmra.mxu1 %vm426_vm5, %v2628_v25  ;;  %785 = vmatprep.subr.mxu0 %v407_v51 }
 0x21d   : > { %2266 = vmatpush1.msk.msra.mxu1 %vm430_vm4, %v408_v48  ;;  %786 = vmatpush1.msra.mxu0 %v406_v47 }
 0x21e   : > { %1020 = vmatprep.subr.mxu1 %v407_v51  ;;  %819 = vmatprep.mubr.f32.mxu0 %v2446_v31 }
 0x21f   : > { %1021 = vmatpush1.msra.mxu1 %v406_v47  ;;  %2258 = vmatmul.mubr.msk.f32.vlgmr.msra.gmra.mxu0 %vm426_vm5, %v2618_v23  ;;  %v2304_v23 = vld [vmem:[%s3474_s5 + $0x1c0] sm:$0xff] (%p64_p0) }
 0x220   : > { %2262 = vmatprep.subr.msk.mxu0 %vm430_vm4, %v421_v38  ;;  %980 = vmatprep.mubr.f32.mxu0 %v2446_v31 }
 0x221   : > { %2263 = vmatpush1.msk.msra.mxu0 %vm430_vm4, %v423_v63  ;;  %1054 = vmatprep.mubr.f32.mxu1 %v2446_v31 }
 0x222   : > { %946 = vmatprep.subr.mxu0 %v417_v39  ;;  %2267 = vmatmul.mubr.msk.f32.vlgmr.msra.gmra.mxu1 %vm426_vm5, %v2633_v26 }
 0x223   : > { %947 = vmatpush1.msra.mxu0 %v422_v53 }
 0x224   : > { %2264 = vmatmul.mubr.msk.f32.vlgmr.msra.gmra.mxu0 %vm426_vm5, %v2638_v27  ;;  %2268 = vmatprep.subr.msk.mxu0 %vm430_vm4, %v591_v37  ;;  %v2303_v27 = vld [vmem:[%s3474_s5 + $0x1b8] sm:$0xff] (%p64_p0) }
 0x225   : > { %2269 = vmatpush1.msk.msra.mxu0 %vm430_vm4, %v593_v40  ;;  %1128 = vmatprep.mubr.f32.mxu0 %v2446_v31 }
 0x226   : > { %1094 = vmatprep.subr.mxu0 %v587_v41  ;;  %v1151_v41 = vpop.permute.xlu0 %1150 }
 0x227   : > { %1095 = vmatpush1.msra.mxu0 %v592_v46 }
 0x228   : > { %2270 = vmatmul.mubr.msk.f32.vlgmr.msra.gmra.mxu0 %vm426_vm5, %v2643_v28  ;;  %v2335_v28 = vld [vmem:[%s3474_s5 + $0x2a8] sm:$0xff] (%p64_p0) }
 0x25c   : > { %v579_v34 = vpop.f32.mrf.mxu1 }
 0x25e   : > { %v581_v43 = vpop.f32.mrf.mxu1 }
 0x2d3   : > { %v501_v50 = vpop.f32.mrf.mxu0  ;;  %v747_v52 = vpop.f32.mrf.mxu1 }
 0x2d4   : > { %v580_v60 = vadd.f32 %v579_v34, %v501_v50 }
 0x2d5   : > { %v503_v58 = vpop.f32.mrf.mxu0  ;;  %v749_v54 = vpop.f32.mrf.mxu1 }
 0x2d6   : > { %v582_v36 = vadd.f32 %v581_v43, %v503_v58 }
 0x2da   : > { %v669_v61 = vpop.f32.mrf.mxu0 }
 0x2db   : > { %v674_v44 = vadd.f32 %v669_v61, %v580_v60 }
 0x2dc   : > { %v671_v49 = vpop.f32.mrf.mxu0  ;;  %v895_v62 = vpop.f32.mrf.mxu1 }
 0x2dd   : > { %v675_v55 = vadd.f32 %v671_v49, %v582_v36 }
 0x2de   : > { %v897_v59 = vpop.f32.mrf.mxu1 }
 0x2df   : > { %v821_v31 = vpop.f32.mrf.mxu0 }
 0x2e0   : > { %v822_v57 = vadd.f32 %v821_v31, %v747_v52  ;;  %v2310_v31 = vld [vmem:[%s3474_s5 + $0x1f0] sm:$0xff] (%p64_p0) }
 0x2e1   : > { %v823_v51 = vpop.f32.mrf.mxu0 }
 0x2e2   : > { %v900_v45 = vadd.f32 %v895_v62, %v822_v57  ;;  %v824_v48 = vadd.f32 %v823_v51, %v749_v54  ;;  %v1056_v30 = vpop.f32.mrf.mxu1  ;;  %v2448_v57 = vmov (%p64_p0), 1966171168  }
 0x2e3   :  { %v1296_v51 = vunpack.c.l.s4 (%p64_p0), %v2448_v57 }
 0x2e4   : > { %v901_v47 = vadd.f32 %v897_v59, %v824_v48  ;;  %v982_v38 = vpop.f32.mrf.mxu0  ;;  %904 = vrot.lane.b32.xlu0 %v900_v45, %s2444_s30  ;;  %v1058_v56 = vpop.f32.mrf.mxu1  ;;  %v2302_v45 = vld [vmem:[%s3474_s5 + $0x1b0] sm:$0xff] (%p64_p0)  ;;  %v2334_v48 = vld [vmem:[%s3474_s5 + $0x2a0] sm:$0xff] (%p64_p0) }
 0x2e5   : > { %v1057_v63 = vadd.f32 %v1056_v30, %v982_v38  ;;  %v1297_v1 = vunpack.c.0.s8 (%p64_p0), %v1296_v51 }
 0x2e6   : > { %v984_v39 = vpop.f32.mrf.mxu0  ;;  %906 = vrot.lane.b32.xlu1 %v901_v47, %s2444_s30  ;;  %v2301_v47 = vld [vmem:[%s3474_s5 + $0x1a8] sm:$0xff] (%p64_p0) }
 0x2e7   : > { %v1059_v33 = vadd.f32 %v1058_v56, %v984_v39  ;;  %v2870_v5 = vsub.s32 (%p64_p0), %v1297_v1, %v2672_v32  ;;  %v2333_v39 = vld [vmem:[%s3474_s5 + $0x298] sm:$0xff] (%p64_p0)  ;;  %v2300_v56 = vld [vmem:[%s3474_s5 + $0x1a0] sm:$0xff] (%p64_p0) }
 0x2e8   : > { %v1130_v37 = vpop.f32.mrf.mxu0 }
 0x2e9   : > { %v1135_v53 = vadd.f32 %v1130_v37, %v1057_v63  ;;  %v2332_v63 = vld [vmem:[%s3474_s5 + $0x290] sm:$0xff] (%p64_p0)  ;;  %v2299_v37 = vld [vmem:[%s3474_s5 + $0x198] sm:$0xff] (%p64_p0) }
 0x2ea   : > { %v1132_v35 = vpop.f32.mrf.mxu0 }
 0x2eb   : > { %v1136_v40 = vadd.f32 %v1132_v35, %v1059_v33  ;;  %1139 = vrot.lane.b32.xlu1 %v1135_v53, %s2445_s10  ;;  %v2331_v33 = vld [vmem:[%s3474_s5 + $0x288] sm:$0xff] (%p64_p0)  ;;  %v2298_v53 = vld [vmem:[%s3474_s5 + $0x190] sm:$0xff] (%p64_p0)  ;;  %v2330_v35 = vld [vmem:[%s3474_s5 + $0x280] sm:$0xff] (%p64_p0) }
 0x2ed   : > { %1141 = vrot.lane.b32.xlu0 %v1136_v40, %s2445_s10  ;;  %v2297_v40 = vld [vmem:[%s3474_s5 + $0x188] sm:$0xff] (%p64_p0) }
 0x356   : > { %v905_v46 = vpop.permute.xlu0 %904 }
 0x358   : > { %v907_v42 = vpop.permute.xlu1 %906 }
 0x359   : > { %v908_v34 = vsel %vm272_vm2, %v905_v46, %v907_v42  ;;  %v912_v43 = vadd.f32 %v907_v42, %v675_v55  ;;  %v2447_v55 = vmov (%p64_p0), 0.0   ;;  %v2296_v42 = vld [vmem:[%s3474_s5 + $0x180] sm:$0xff] (%p64_p0)  ;;  %v2328_v46 = vld [vmem:[%s3474_s5 + $0x270] sm:$0xff] (%p64_p0) }
 0x35a   : > { %v911_v50 = vadd.f32 %v908_v34, %v674_v44  ;;  %v2311_v44 = vld [vmem:[%s3474_s5 + $0x1f8] sm:$0xff] (%p64_p0)  ;;  %1365 = vmatprep.subr.mxu0 (%p64_p0), %v2447_v55  ;;  %1556 = vmatprep.subr.mxu1 (%p64_p0), %v2447_v55 }
 0x35b   :  { %1366 = vmatpush1.msra.mxu0 (%p64_p0), %v2311_v44  ;;  %1557 = vmatpush1.msra.mxu1 (%p64_p0), %v2337_v21  ;;  %v2319_v34 = vld [vmem:[%s3474_s5 + $0x238] sm:$0xf] (%p64_p0) }
 0x35c   :  { %1367 = vmatprep.subr.mxu0 (%p64_p0), %v2447_v55  ;;  %1558 = vmatprep.subr.mxu1 (%p64_p0), %v2447_v55 }
 0x35d   : > { %v1140_v52 = vpop.permute.xlu1 %1139  ;;  %1368 = vmatpush1.msra.mxu0 (%p64_p0), %v2310_v31  ;;  %1559 = vmatpush1.msra.mxu1 (%p64_p0), %v2336_v22  ;;  %v2323_v31 = vld [vmem:[%s3474_s5 + $0x248] sm:$0xff] (%p64_p0)  ;;  %v2345_v22 = vld [vmem:[%s3474_s5 + $0x2f8] sm:$0xf] (%p64_p0) }
 0x35e   :  { %1369 = vmatprep.subr.mxu0 (%p64_p0), %v2447_v55  ;;  %1560 = vmatprep.subr.mxu1 (%p64_p0), %v2447_v55 }
 0x35f   : > { %v1142_v58 = vpop.permute.xlu0 %1141  ;;  %1370 = vmatpush1.msra.mxu0 (%p64_p0), %v2309_v0  ;;  %1561 = vmatpush1.msra.mxu1 (%p64_p0), %v2335_v28 }
 0x360   : > { %v1143_v36 = vsel %vm381_vm3, %v1140_v52, %v1142_v58  ;;  %v1147_v54 = vadd.f32 %v1142_v58, %v912_v43  ;;  %1371 = vmatprep.subr.mxu0 (%p64_p0), %v2447_v55  ;;  %1562 = vmatprep.subr.mxu1 (%p64_p0), %v2447_v55  ;;  %v2327_v43 = vld [vmem:[%s3474_s5 + $0x268] sm:$0xff] (%p64_p0)  ;;  %v2326_v52 = vld [vmem:[%s3474_s5 + $0x260] sm:$0xff] (%p64_p0) }
 0x361   : > { %v1146_v60 = vadd.f32 %v1143_v36, %v911_v50  ;;  %1372 = vmatpush1.msra.mxu0 (%p64_p0), %v2308_v2  ;;  %1563 = vmatpush1.msra.mxu1 (%p64_p0), %v2334_v48  ;;  %v2318_v50 = vld [vmem:[%s3474_s5 + $0x230] sm:$0xff] (%p64_p0)  ;;  %v2317_v58 = vld [vmem:[%s3474_s5 + $0x228] sm:$0xff] (%p64_p0)  ;;  %v2316_v36 = vld [vmem:[%s3474_s5 + $0x220] sm:$0xff] (%p64_p0) }
 0x362   : > { %v1154_v61 = vadd.f32 %v1151_v41, %v1147_v54  ;;  %1373 = vmatprep.subr.mxu0 (%p64_p0), %v2447_v55  ;;  %1564 = vmatprep.subr.mxu1 (%p64_p0), %v2447_v55  ;;  %v2325_v54 = vld [vmem:[%s3474_s5 + $0x258] sm:$0xff] (%p64_p0)  ;;  %v2314_v2 = vld [vmem:[%s3474_s5 + $0x210] sm:$0xff] (%p64_p0) }
 0x363   : > { %v1153_v49 = vadd.f32 %v1151_v41, %v1146_v60  ;;  %66 = sbr.rel (!%p64_p0) target bundleno = 12 (0xc), region = 108  ;;  %1374 = vmatpush1.msra.mxu0 (%p64_p0), %v2307_v3  ;;  %1565 = vmatpush1.msra.mxu1 (%p64_p0), %v2333_v39  ;;  %v2329_v41 = vld [vmem:[%s3474_s5 + $0x278] sm:$0xff] (%p64_p0)  ;;  %v2324_v60 = vld [vmem:[%s3474_s5 + $0x250] sm:$0xff] (%p64_p0)  ;;  %v2343_v39 = vld [vmem:[%s3474_s5 + $0x2e8] sm:$0xff] (%p64_p0) }
 0x364   : > { %v1156_v62 = vmax.f32 %v1154_v61, 0.0  ;;  %1375 = vmatprep.subr.mxu0 (%p64_p0), %v2447_v55  ;;  %1566 = vmatprep.subr.mxu1 (%p64_p0), %v2447_v55  ;;  %v2315_v61 = vld [vmem:[%s3474_s5 + $0x218] sm:$0xff] (%p64_p0) }
 0x365   : > { %v1155_v59 = vmax.f32 %v1153_v49, 0.0  ;;  %1376 = vmatpush1.msra.mxu0 (%p64_p0), %v2306_v4  ;;  %1567 = vmatpush1.msra.mxu1 (%p64_p0), %v2332_v63 }
 0x366   : > { %1161 = vst.msk [vmem:[%s1158_s11 + $0x8] sm:$0x1f] %vm1160_vm6, %v1156_v62  ;;  %1377 = vmatprep.subr.mxu0 (%p64_p0), %v2447_v55  ;;  %1568 = vmatprep.subr.mxu1 (%p64_p0), %v2447_v55 }
 0x367   : > { %1159 = vst [vmem:[%s1158_s11] sm:$0x1f] %v1155_v59  ;;  %1378 = vmatpush1.msra.mxu0 (%p64_p0), %v2305_v8  ;;  %1569 = vmatpush1.msra.mxu1 (%p64_p0), %v2331_v33 }
 0x368   :  { %1379 = vmatprep.subr.mxu0 %v2447_v55  ;;  %1570 = vmatprep.subr.mxu1 %v2447_v55 }
 0x369   :  { %1380 = vmatpush1.msra.mxu0 %v2304_v23  ;;  %1571 = vmatpush1.msra.mxu1 %v2330_v35  ;;  %v2312_v23 = vld [vmem:[%s3474_s5 + $0x200] sm:$0xff] }
 0x36a   :  { %1381 = vmatprep.subr.mxu0 %v2447_v55  ;;  %1572 = vmatprep.subr.mxu1 %v2447_v55  ;;  %v2342_v35 = vld [vmem:[%s3474_s5 + $0x2e0] sm:$0xff] }
 0x36b   :  { %1382 = vmatpush1.msra.mxu0 %v2303_v27  ;;  %1573 = vmatpush1.msra.mxu1 %v2329_v41 }
 0x36c   :  { %1383 = vmatprep.subr.mxu0 %v2447_v55  ;;  %1574 = vmatprep.subr.mxu1 %v2447_v55 }
 0x36d   :  { %1384 = vmatpush1.msra.mxu0 %v2302_v45  ;;  %1575 = vmatpush1.msra.mxu1 %v2328_v46  ;;  %v2344_v45 = vld [vmem:[%s3474_s5 + $0x2f0] sm:$0xff]  ;;  %v2341_v46 = vld [vmem:[%s3474_s5 + $0x2d8] sm:$0xff] }
 0x36e   :  { %v1243_v6 = vld [vmem:[#allocation2 + $0x2] ss:$8 sm:$0x3]  ;;  %v1245_v7 = vld [vmem:[#allocation2 + $0x12] ss:$8 sm:$0x3]  ;;  %1385 = vmatprep.subr.mxu0 %v2447_v55  ;;  %1576 = vmatprep.subr.mxu1 %v2447_v55 }
 0x36f   :  { %v1247_v9 = vld [vmem:[#allocation2 + $0x22] ss:$8 sm:$0x3]  ;;  %v1249_v10 = vld [vmem:[#allocation2 + $0x32] ss:$8 sm:$0x3]  ;;  %v1291_v11 = vcombine.low %v1243_v6, %v1245_v7  ;;  %1386 = vmatpush1.msra.mxu0 %v2301_v47  ;;  %1577 = vmatpush1.msra.mxu1 %v2327_v43 }
 0x370   :  { %v1251_v12 = vld [vmem:[#allocation2 + $0x42] ss:$8 sm:$0x3]  ;;  %v1253_v13 = vld [vmem:[#allocation2 + $0x52] ss:$8 sm:$0x3]  ;;  %v1292_v14 = vcombine.low %v1247_v9, %v1249_v10  ;;  %1387 = vmatprep.subr.mxu0 %v2447_v55  ;;  %1578 = vmatprep.subr.mxu1 %v2447_v55 }
 0x371   :  { %v1255_v15 = vld [vmem:[#allocation2 + $0x62] ss:$8 sm:$0x3]  ;;  %v1257_v16 = vld [vmem:[#allocation2 + $0x72] ss:$8 sm:$0x3]  ;;  %v1293_v17 = vcombine.low %v1251_v12, %v1253_v13  ;;  %v2878_v18 = vrot.slane %v1291_v11, %v2870_v5  ;;  %1388 = vmatpush1.msra.mxu0 %v2300_v56  ;;  %1579 = vmatpush1.msra.mxu1 %v2326_v52 }
 0x372   :  { %v1294_v19 = vcombine.low %v1255_v15, %v1257_v16  ;;  %v2881_v20 = vrot.slane %v1292_v14, %v2870_v5  ;;  %1389 = vmatprep.subr.mxu0 %v2447_v55  ;;  %v1436_v59 = vld [vmem:[#allocation2 + $0x3] ss:$8 sm:$0x3]  ;;  %v1438_v44 = vld [vmem:[#allocation2 + $0x13] ss:$8 sm:$0x3]  ;;  %1580 = vmatprep.subr.mxu1 %v2447_v55 }
 0x373   :  { %v2894_v24 = vrot.slane %v1293_v17, %v2870_v5  ;;  %1390 = vmatpush1.msra.mxu0 %v2299_v37  ;;  %v1440_v57 = vld [vmem:[#allocation2 + $0x23] ss:$8 sm:$0x3]  ;;  %v1442_v51 = vld [vmem:[#allocation2 + $0x33] ss:$8 sm:$0x3]  ;;  %1581 = vmatpush1.msra.mxu1 %v2325_v54  ;;  %v1484_v12 = vcombine.low %v1436_v59, %v1438_v44 }
 0x374   :  { %v2897_v25 = vrot.slane %v1294_v19, %v2870_v5  ;;  %v1324_v26 = vcombine.high %v2878_v18, %v2881_v20  ;;  %1391 = vmatprep.subr.mxu0 %v2447_v55  ;;  %v1323_v49 = vcombine.low %v2878_v18, %v2881_v20  ;;  %v1444_v0 = vld [vmem:[#allocation2 + $0x43] ss:$8 sm:$0x3]  ;;  %v1446_v1 = vld [vmem:[#allocation2 + $0x53] ss:$8 sm:$0x3]  ;;  %1582 = vmatprep.subr.mxu1 %v2447_v55 }
 0x375   :  { %1392 = vmatpush1.msra.mxu0 %v2298_v53  ;;  %v1448_v3 = vld [vmem:[#allocation2 + $0x63] ss:$8 sm:$0x3]  ;;  %v1450_v4 = vld [vmem:[#allocation2 + $0x73] ss:$8 sm:$0x3]  ;;  %1583 = vmatpush1.msra.mxu1 %v2324_v60  ;;  %v1485_v17 = vcombine.low %v1440_v57, %v1442_v51  ;;  %v1486_v18 = vcombine.low %v1444_v0, %v1446_v1 }
 0x376   :  { %v1326_v29 = vcombine.high %v2894_v24, %v2897_v25  ;;  %v1340_v32 = vrot.slane %v1324_v26, %v2870_v5  ;;  %1393 = vmatprep.subr.mxu0 %v2447_v55  ;;  %v1325_v62 = vcombine.low %v2894_v24, %v2897_v25  ;;  %v2322_v6 = vld [vmem:[%s3474_s5 + $0x240] sm:$0xff]  ;;  %v1164_v8 = vld [vmem:[#allocation2 + $0x10] ss:$8 sm:$0x3]  ;;  %v2313_v9 = vld [vmem:[%s3474_s5 + $0x208] sm:$0xff]  ;;  %v1333_v10 = vrot.slane %v1323_v49, %v2870_v5 }
 0x377   :  { %1394 = vmatpush1.msra.mxu0 %v2297_v40  ;;  %v1162_v7 = vld [vmem:[#allocation2] ss:$8 sm:$0x3]  ;;  %v1168_v14 = vld [vmem:[#allocation2 + $0x30] ss:$8 sm:$0x3]  ;;  %1584 = vmatprep.subr.mxu1 %v2447_v55  ;;  %v1487_v19 = vcombine.low %v1448_v3, %v1450_v4  ;;  %v1494_v25 = vrot.slane %v1484_v12, %v2870_v5  ;;  %v1501_v48 = vrot.slane %v1485_v17, %v2870_v5 }
 0x378   :  { %v1354_v30 = vrot.slane %v1326_v29, %v2870_v5  ;;  %1395 = vmatprep.subr.mxu0 %v2447_v55  ;;  %v1347_v11 = vrot.slane %v1325_v62, %v2870_v5  ;;  %v1166_v13 = vld [vmem:[#allocation2 + $0x20] ss:$8 sm:$0x3]  ;;  %v1172_v16 = vld [vmem:[#allocation2 + $0x50] ss:$8 sm:$0x3]  ;;  %1585 = vmatpush1.msra.mxu1 %v2323_v31  ;;  %v1634_v26 = vcombine.low %v1162_v7, %v1164_v8 }
 0x379   :  { %1396 = vmatpush1.msra.mxu0 %v2296_v42  ;;  %v1170_v15 = vld [vmem:[#allocation2 + $0x40] ss:$8 sm:$0x3]  ;;  %v1176_v21 = vld [vmem:[#allocation2 + $0x70] ss:$8 sm:$0x3]  ;;  %1586 = vmatprep.subr.mxu1 %v2447_v55  ;;  %v1635_v27 = vcombine.low %v1166_v13, %v1168_v14  ;;  %v1515_v47 = vrot.slane %v1487_v19, %v2870_v5  ;;  %v1517_v40 = vcombine.high %v1494_v25, %v1501_v48 }
 0x37a   :  { %v1356_v38 = vcombine.low %v1340_v32, %v1354_v30  ;;  %1413 = vmatprep.subr.mxu0 %v2447_v55  ;;  %v1174_v20 = vld [vmem:[#allocation2 + $0x60] ss:$8 sm:$0x3]  ;;  %v1355_v24 = vcombine.low %v1333_v10, %v1347_v11  ;;  %1587 = vmatpush1.msra.mxu1 %v2322_v6  ;;  %v1636_v28 = vcombine.low %v1170_v15, %v1172_v16  ;;  %v1192_v32 = vld [vmem:[%s3474_s5 + $0x78] sm:$0xff]  ;;  %v1183_v7 = vld [vmem:[%s3474_s5 + $0x30] sm:$0xff] }
 0x37b   :  { %2320 = vmatpush2.msk.msra.mxu0 %vm1361_vm8, %v2319_v34  ;;  %1604 = vmatprep.subr.mxu1 %v2447_v55  ;;  %v1637_v29 = vcombine.low %v1174_v20, %v1176_v21  ;;  %v1508_v30 = vrot.slane %v1486_v18, %v2870_v5  ;;  %v3059_v56 = vrot.slane %v1634_v26, %v2870_v5  ;;  %v1190_v53 = vld [vmem:[%s3474_s5 + $0x68] sm:$0xff]  ;;  %v1189_v42 = vld [vmem:[%s3474_s5 + $0x60] sm:$0xff]  ;;  %v1184_v4 = vld [vmem:[%s3474_s5 + $0x38] sm:$0xff] }
 0x37c   :  { %2321 = vmatprep.mubr.msk.f32.mxu0 %vm1358_vm7, %v1356_v38  ;;  %1415 = vmatprep.subr.mxu0 %v2447_v55  ;;  %v1191_v38 = vld [vmem:[%s3474_s5 + $0x70] sm:$0xff]  ;;  %v3062_v63 = vrot.slane %v1635_v27, %v2870_v5  ;;  %v3065_v37 = vrot.slane %v1636_v28, %v2870_v5  ;;  %v1516_v34 = vcombine.low %v1494_v25, %v1501_v48  ;;  %v2339_v49 = vld [vmem:[%s3474_s5 + $0x2c8] sm:$0xff]  ;;  %v2338_v51 = vld [vmem:[%s3474_s5 + $0x2c0] sm:$0xff] }
 0x37d   :  { %1416 = vmatpush2.msra.mxu0 %v2318_v50  ;;  %2346 = vmatpush2.msk.msra.mxu1 %vm1361_vm8, %v2345_v22  ;;  %v3068_v33 = vrot.slane %v1637_v29, %v2870_v5  ;;  %v1519_v41 = vcombine.high %v1508_v30, %v1515_v47  ;;  %v1518_v43 = vcombine.low %v1508_v30, %v1515_v47  ;;  %v1186_v57 = vld [vmem:[%s3474_s5 + $0x48] sm:$0xff]  ;;  %v1185_v1 = vld [vmem:[%s3474_s5 + $0x40] sm:$0xff]  ;;  %v2365_v6 = vld [vmem:[%s3474_s5 + $0x378] sm:$0xff] }
 0x37e   :  { %1417 = vmatprep.subr.mxu0 %v2447_v55  ;;  %1606 = vmatprep.subr.mxu1 %v2447_v55  ;;  %v1667_v50 = vcombine.high %v3059_v56, %v3062_v63  ;;  %v1533_v54 = vrot.slane %v1517_v40, %v2870_v5  ;;  %v1526_v62 = vrot.slane %v1516_v34, %v2870_v5  ;;  %v2364_v8 = vld [vmem:[%s3474_s5 + $0x370] sm:$0xff]  ;;  %v2363_v10 = vld [vmem:[%s3474_s5 + $0x368] sm:$0xff]  ;;  %v1181_v11 = vld [vmem:[%s3474_s5 + $0x20] sm:$0xff] }
 0x37f   :  { %1418 = vmatpush2.msra.mxu0 %v2317_v58  ;;  %1607 = vmatpush2.msra.mxu1 %v2344_v45  ;;  %v1669_v52 = vcombine.high %v3065_v37, %v3068_v33  ;;  %v1188_v58 = vld [vmem:[%s3474_s5 + $0x58] sm:$0xff]  ;;  %v1547_v60 = vrot.slane %v1519_v41, %v2870_v5  ;;  %v1540_v59 = vrot.slane %v1518_v43, %v2870_v5  ;;  %v2362_v12 = vld [vmem:[%s3474_s5 + $0x360] sm:$0xff]  ;;  %v1179_v15 = vld [vmem:[%s3474_s5 + $0x10] sm:$0xff] }
 0x380   :  { %1419 = vmatprep.subr.mxu0 %v2447_v55  ;;  %1608 = vmatprep.subr.mxu1 %v2447_v55  ;;  %v1683_v44 = vrot.slane %v1667_v50, %v2870_v5  ;;  %v1180_v13 = vld [vmem:[%s3474_s5 + $0x18] sm:$0xff]  ;;  %v2360_v16 = vld [vmem:[%s3474_s5 + $0x350] sm:$0xff]  ;;  %v1178_v17 = vld [vmem:[%s3474_s5 + $0x8] sm:$0xff]  ;;  %v1666_v28 = vcombine.low %v3059_v56, %v3062_v63  ;;  %v1668_v29 = vcombine.low %v3065_v37, %v3068_v33 }
 0x381   :  { %1420 = vmatpush2.msra.mxu0 %v2316_v36  ;;  %1609 = vmatpush2.msra.mxu1 %v2343_v39  ;;  %v2340_v36 = vld [vmem:[%s3474_s5 + $0x2d0] sm:$0xff]  ;;  %v1697_v31 = vrot.slane %v1669_v52, %v2870_v5  ;;  %v1549_v0 = vcombine.low %v1533_v54, %v1547_v60  ;;  %v2361_v14 = vld [vmem:[%s3474_s5 + $0x358] sm:$0xff]  ;;  %v2359_v18 = vld [vmem:[%s3474_s5 + $0x348] sm:$0xff] }
 0x382   :  { %1421 = vmatprep.subr.mxu0 %v2447_v55  ;;  %1610 = vmatprep.subr.mxu1 %v2447_v55  ;;  %v1177_v19 = vld [vmem:[%s3474_s5] sm:$0xff]  ;;  %v1200_v21 = vld [vmem:[%s3474_s5 + $0xb8] sm:$0xf]  ;;  %v1198_v25 = vld [vmem:[%s3474_s5 + $0xa8] sm:$0xff]  ;;  %v1676_v39 = vrot.slane %v1666_v28, %v2870_v5  ;;  %v1690_v56 = vrot.slane %v1668_v29, %v2870_v5 }
 0x383   :  { %1422 = vmatpush2.msra.mxu0 %v2315_v61  ;;  %1611 = vmatpush2.msra.mxu1 %v2342_v35  ;;  %v1187_v61 = vld [vmem:[%s3474_s5 + $0x50] sm:$0xff]  ;;  %v1699_v3 = vcombine.low %v1683_v44, %v1697_v31  ;;  %v2358_v20 = vld [vmem:[%s3474_s5 + $0x340] sm:$0xff]  ;;  %v2357_v22 = vld [vmem:[%s3474_s5 + $0x338] sm:$0xff] }
 0x384   :  { %1423 = vmatprep.subr.mxu0 %v2447_v55  ;;  %1612 = vmatprep.subr.mxu1 %v2447_v55  ;;  %v2355_v26 = vld [vmem:[%s3474_s5 + $0x328] sm:$0xff]  ;;  %v1197_v27 = vld [vmem:[%s3474_s5 + $0xa0] sm:$0xff]  ;;  %v1196_v45 = vld [vmem:[%s3474_s5 + $0x98] sm:$0xff] }
 0x385   :  { %1424 = vmatpush2.msra.mxu0 %v2314_v2  ;;  %1613 = vmatpush2.msra.mxu1 %v2341_v46  ;;  %v1548_v2 = vcombine.low %v1526_v62, %v1540_v59  ;;  %v1195_v48 = vld [vmem:[%s3474_s5 + $0x90] sm:$0xff]  ;;  %v2353_v30 = vld [vmem:[%s3474_s5 + $0x318] sm:$0xff]  ;;  %v1777_v63 = vld [vmem:[#allocation2 + $0x4] ss:$8 sm:$0x3] }
 0x386   :  { %1425 = vmatprep.subr.mxu0 %v2447_v55  ;;  %1614 = vmatprep.subr.mxu1 %v2447_v55  ;;  %v2352_v47 = vld [vmem:[%s3474_s5 + $0x310] sm:$0xff]  ;;  %v2351_v33 = vld [vmem:[%s3474_s5 + $0x308] sm:$0xff]  ;;  %v1193_v34 = vld [vmem:[%s3474_s5 + $0x80] sm:$0xff] }
 0x387   :  { %1426 = vmatpush2.msra.mxu0 %v2313_v9  ;;  %1615 = vmatpush2.msra.mxu1 %v2340_v36  ;;  %v1182_v9 = vld [vmem:[%s3474_s5 + $0x28] sm:$0xff]  ;;  %v1779_v37 = vld [vmem:[#allocation2 + $0x14] ss:$8 sm:$0x3]  ;;  %v1698_v36 = vcombine.low %v1676_v39, %v1690_v56  ;;  %v2350_v44 = vld [vmem:[%s3474_s5 + $0x300] sm:$0xff] }
 0x388   :  { %1427 = vmatprep.subr.mxu0 %v2447_v55  ;;  %1616 = vmatprep.subr.mxu1 %v2447_v55  ;;  %v1783_v35 = vld [vmem:[#allocation2 + $0x34] ss:$8 sm:$0x3]  ;;  %v1785_v40 = vld [vmem:[#allocation2 + $0x44] ss:$8 sm:$0x3] }
 0x389   :  { %1428 = vmatpush2.msra.mxu0 %v2312_v23  ;;  %1617 = vmatpush2.msra.mxu1 %v2339_v49  ;;  %v1199_v23 = vld [vmem:[%s3474_s5 + $0xb0] sm:$0xff]  ;;  %v1202_v43 = vld [vmem:[#allocation2 + $0x1] ss:$8 sm:$0x3]  ;;  %v2287_v59 = vld [vmem:[%s3474_s5 + $0x138] sm:$0xff] }
 0x38a   :  { %1430 = vmatmul.mubr.f32.vlgmr.msra.gmra.mxu0 %v1355_v24  ;;  %1706 = vmatprep.subr.mxu0 %v2447_v55  ;;  %v2356_v24 = vld [vmem:[%s3474_s5 + $0x330] sm:$0xff]  ;;  %v1206_v52 = vld [vmem:[#allocation2 + $0x21] ss:$8 sm:$0x3] }
 0x38b   :  { %1707 = vmatpush1.msra.mxu0 %v1192_v32  ;;  %1618 = vmatprep.subr.mxu1 %v2447_v55  ;;  %v2354_v32 = vld [vmem:[%s3474_s5 + $0x320] sm:$0xff]  ;;  %v1787_v41 = vld [vmem:[#allocation2 + $0x54] ss:$8 sm:$0x3]  ;;  %v2281_v29 = vld [vmem:[%s3474_s5 + $0x108] sm:$0xff] }
 0x38c   :  { %1708 = vmatprep.subr.mxu0 %v2447_v55  ;;  %1619 = vmatpush2.msra.mxu1 %v2338_v51  ;;  %v1791_v46 = vld [vmem:[#allocation2 + $0x74] ss:$8 sm:$0x3]  ;;  %v1204_v50 = vld [vmem:[#allocation2 + $0x11] ss:$8 sm:$0x3] }
 0x38d   :  { %1709 = vmatpush1.msra.mxu0 %v1191_v38  ;;  %2347 = vmatprep.mubr.msk.f32.mxu1 %vm1358_vm7, %v1549_v0  ;;  %v1194_v38 = vld [vmem:[%s3474_s5 + $0x88] sm:$0xff]  ;;  %v1212_v60 = vld [vmem:[#allocation2 + $0x51] ss:$8 sm:$0x3]  ;;  %v1975_v0 = vcombine.low %v1202_v43, %v1204_v50 }
 0x38e   :  { %1710 = vmatprep.subr.mxu0 %v2447_v55  ;;  %1897 = vmatprep.subr.mxu1 %v2447_v55  ;;  %v1210_v54 = vld [vmem:[#allocation2 + $0x41] ss:$8 sm:$0x3]  ;;  %v1216_v62 = vld [vmem:[#allocation2 + $0x71] ss:$8 sm:$0x3] }
 0x38f   :  { %1711 = vmatpush1.msra.mxu0 %v1190_v53  ;;  %1621 = vmatmul.mubr.f32.vlgmr.msra.gmra.mxu1 %v1548_v2  ;;  %v1781_v53 = vld [vmem:[#allocation2 + $0x24] ss:$8 sm:$0x3]  ;;  %v1214_v49 = vld [vmem:[#allocation2 + $0x61] ss:$8 sm:$0x3] }
 0x390   :  { %1712 = vmatprep.subr.mxu0 %v2447_v55  ;;  %2349 = vmatprep.mubr.msk.f32.mxu0 %vm1358_vm7, %v1699_v3  ;;  %v1826_v31 = vcombine.low %v1781_v53, %v1783_v35  ;;  %v2373_v2 = vld [vmem:[%s3474_s5 + $0x3b8] sm:$0xf]  ;;  %v2367_v39 = vld [vmem:[%s3474_s5 + $0x388] sm:$0xff]  ;;  %v2274_v43 = vld [vmem:[%s3474_s5 + $0xd0] sm:$0xff] }
 0x391   :  { %1713 = vmatpush1.msra.mxu0 %v1189_v42  ;;  %1898 = vmatpush1.msra.mxu1 %v2365_v6  ;;  %v1789_v42 = vld [vmem:[#allocation2 + $0x64] ss:$8 sm:$0x3]  ;;  %v1978_v6 = vcombine.low %v1214_v49, %v1216_v62  ;;  %v2291_v62 = vld [vmem:[%s3474_s5 + $0x158] sm:$0xff] }
 0x392   :  { %1714 = vmatprep.subr.mxu0 %v2447_v55  ;;  %1899 = vmatprep.subr.mxu1 %v2447_v55  ;;  %v1828_v51 = vcombine.low %v1789_v42, %v1791_v46  ;;  %v2277_v42 = vld [vmem:[%s3474_s5 + $0xe8] sm:$0xff]  ;;  %v2276_v46 = vld [vmem:[%s3474_s5 + $0xe0] sm:$0xff] }
 0x393   :  { %1715 = vmatpush1.msra.mxu0 %v1188_v58  ;;  %1900 = vmatpush1.msra.mxu1 %v2364_v8  ;;  %v1208_v58 = vld [vmem:[#allocation2 + $0x31] ss:$8 sm:$0x3]  ;;  %v2285_v8 = vld [vmem:[%s3474_s5 + $0x128] sm:$0xff] }
 0x394   :  { %1716 = vmatprep.subr.mxu0 %v2447_v55  ;;  %1901 = vmatprep.subr.mxu1 %v2447_v55  ;;  %v1976_v3 = vcombine.low %v1206_v52, %v1208_v58  ;;  %v2273_v50 = vld [vmem:[%s3474_s5 + $0xc8] sm:$0xff]  ;;  %v2272_v52 = vld [vmem:[%s3474_s5 + $0xc0] sm:$0xff]  ;;  %v2295_v58 = vld [vmem:[%s3474_s5 + $0x178] sm:$0xf] }
 0x395   :  { %1717 = vmatpush1.msra.mxu0 %v1187_v61  ;;  %1902 = vmatpush1.msra.mxu1 %v2363_v10  ;;  %v1825_v61 = vcombine.low %v1777_v63, %v1779_v37  ;;  %v1842_v10 = vrot.slane %v1826_v31, %v2870_v5  ;;  %v2279_v37 = vld [vmem:[%s3474_s5 + $0xf8] sm:$0xff] }
 0x396   :  { %1718 = vmatprep.subr.mxu0 %v2447_v55  ;;  %1903 = vmatprep.subr.mxu1 %v2447_v55 }
 0x397   :  { %1719 = vmatpush1.msra.mxu0 %v1186_v57  ;;  %1904 = vmatpush1.msra.mxu1 %v2362_v12  ;;  %v1827_v57 = vcombine.low %v1785_v40, %v1787_v41  ;;  %v1856_v12 = vrot.slane %v1828_v51, %v2870_v5  ;;  %v2278_v40 = vld [vmem:[%s3474_s5 + $0xf0] sm:$0xff]  ;;  %v2288_v51 = vld [vmem:[%s3474_s5 + $0x140] sm:$0xff] }
 0x398   :  { %1720 = vmatprep.subr.mxu0 %v2447_v55  ;;  %1905 = vmatprep.subr.mxu1 %v2447_v55 }
 0x399   :  { %1721 = vmatpush1.msra.mxu0 %v1185_v1  ;;  %1906 = vmatpush1.msra.mxu1 %v2361_v14  ;;  %v2286_v1 = vld [vmem:[%s3474_s5 + $0x130] sm:$0xff]  ;;  %v2284_v14 = vld [vmem:[%s3474_s5 + $0x120] sm:$0xff] }
 0x39a   :  { %1722 = vmatprep.subr.mxu0 %v2447_v55  ;;  %1907 = vmatprep.subr.mxu1 %v2447_v55 }
 0x39b   :  { %1723 = vmatpush1.msra.mxu0 %v1184_v4  ;;  %1908 = vmatpush1.msra.mxu1 %v2360_v16  ;;  %v1977_v4 = vcombine.low %v1210_v54, %v1212_v60  ;;  %v3298_v16 = vrot.slane %v1976_v3, %v2870_v5  ;;  %v2293_v54 = vld [vmem:[%s3474_s5 + $0x168] sm:$0xff]  ;;  %v2292_v60 = vld [vmem:[%s3474_s5 + $0x160] sm:$0xff] }
 0x39c   :  { %1724 = vmatprep.subr.mxu0 %v2447_v55  ;;  %1909 = vmatprep.subr.mxu1 %v2447_v55  ;;  %v2132_v3 = vld [vmem:[%s3476_s7 + $0x20] sm:$0xff] }
 0x39d   :  { %1725 = vmatpush1.msra.mxu0 %v1183_v7  ;;  %1910 = vmatpush1.msra.mxu1 %v2359_v18  ;;  %v1835_v7 = vrot.slane %v1825_v61, %v2870_v5  ;;  %v3304_v18 = vrot.slane %v1978_v6, %v2870_v5  ;;  %v2130_v6 = vld [vmem:[%s3476_s7 + $0x10] sm:$0xff] }
 0x39e   :  { %1726 = vmatprep.subr.mxu0 %v2447_v55  ;;  %1911 = vmatprep.subr.mxu1 %v2447_v55 }
 0x39f   :  { %1727 = vmatpush1.msra.mxu0 %v1182_v9  ;;  %1912 = vmatpush1.msra.mxu1 %v2358_v20  ;;  %v2372_v9 = vld [vmem:[%s3474_s5 + $0x3b0] sm:$0xff]  ;;  %v2370_v20 = vld [vmem:[%s3474_s5 + $0x3a0] sm:$0xff] }
 0x3a0   :  { %1728 = vmatprep.subr.mxu0 %v2447_v55  ;;  %1913 = vmatprep.subr.mxu1 %v2447_v55 }
 0x3a1   :  { %1729 = vmatpush1.msra.mxu0 %v1181_v11  ;;  %1914 = vmatpush1.msra.mxu1 %v2357_v22  ;;  %v1849_v11 = vrot.slane %v1827_v57, %v2870_v5  ;;  %v2289_v57 = vld [vmem:[%s3474_s5 + $0x148] sm:$0xff] }
 0x3a2   :  { %1730 = vmatprep.subr.mxu0 %v2447_v55  ;;  %1915 = vmatprep.subr.mxu1 %v2447_v55 }
 0x3a3   :  { %1731 = vmatpush1.msra.mxu0 %v1180_v13  ;;  %1916 = vmatpush1.msra.mxu1 %v2356_v24  ;;  %v3287_v13 = vrot.slane %v1975_v0, %v2870_v5  ;;  %v1860_v22 = vcombine.high %v1849_v11, %v1856_v12  ;;  %v1859_v24 = vcombine.low %v1849_v11, %v1856_v12 }
 0x3a4   :  { %1732 = vmatprep.subr.mxu0 %v2447_v55  ;;  %1917 = vmatprep.subr.mxu1 %v2447_v55 }
 0x3a5   :  { %1733 = vmatpush1.msra.mxu0 %v1179_v15  ;;  %1918 = vmatpush1.msra.mxu1 %v2355_v26  ;;  %v2371_v15 = vld [vmem:[%s3474_s5 + $0x3a8] sm:$0xff]  ;;  %v2369_v26 = vld [vmem:[%s3474_s5 + $0x398] sm:$0xff]  ;;  %v2007_v61 = vcombine.low %v3287_v13, %v3298_v16 }
 0x3a6   :  { %1734 = vmatprep.subr.mxu0 %v2447_v55  ;;  %1919 = vmatprep.subr.mxu1 %v2447_v55 }
 0x3a7   :  { %1735 = vmatpush1.msra.mxu0 %v1178_v17  ;;  %1920 = vmatpush1.msra.mxu1 %v2354_v32  ;;  %v3301_v17 = vrot.slane %v1977_v4, %v2870_v5  ;;  %v2368_v32 = vld [vmem:[%s3474_s5 + $0x390] sm:$0xff]  ;;  %v2131_v4 = vld [vmem:[%s3476_s7 + $0x18] sm:$0xff] }
 0x3a8   :  { %1736 = vmatprep.subr.mxu0 %v2447_v55  ;;  %1921 = vmatprep.subr.mxu1 %v2447_v55 }
 0x3a9   :  { %1737 = vmatpush1.msra.mxu0 %v1177_v19  ;;  %1922 = vmatpush1.msra.mxu1 %v2353_v30  ;;  %v2283_v19 = vld [vmem:[%s3474_s5 + $0x118] sm:$0xff]  ;;  %v2010_v28 = vcombine.high %v3301_v17, %v3304_v18  ;;  %v2009_v49 = vcombine.low %v3301_v17, %v3304_v18 }
 0x3aa   :  { %1754 = vmatprep.subr.mxu0 %v2447_v55  ;;  %1923 = vmatprep.subr.mxu1 %v2447_v55 }
 0x3ab   :  { %2348 = vmatpush2.msk.msra.mxu0 %vm1361_vm8, %v1200_v21  ;;  %1924 = vmatpush1.msra.mxu1 %v2352_v47  ;;  %v1858_v21 = vcombine.high %v1835_v7, %v1842_v10  ;;  %v1881_v47 = vrot.slane %v1859_v24, %v2870_v5  ;;  %v2038_v63 = vrot.slane %v2010_v28, %v2870_v5 }
 0x3ac   :  { %1756 = vmatprep.subr.mxu0 %v2447_v55  ;;  %1925 = vmatprep.subr.mxu1 %v2447_v55  ;;  %v2031_v31 = vrot.slane %v2009_v49, %v2870_v5 }
 0x3ad   :  { %1757 = vmatpush2.msra.mxu0 %v1199_v23  ;;  %1926 = vmatpush1.msra.mxu1 %v2351_v33  ;;  %v1857_v23 = vcombine.low %v1835_v7, %v1842_v10  ;;  %v2366_v33 = vld [vmem:[%s3474_s5 + $0x380] sm:$0xff]  ;;  %v2129_v7 = vld [vmem:[%s3476_s7 + $0x8] sm:$0xff] }
 0x3ae   :  { %1758 = vmatprep.subr.mxu0 %v2447_v55  ;;  %1927 = vmatprep.subr.mxu1 %v2447_v55 }
 0x3af   :  { %1759 = vmatpush2.msra.mxu0 %v1198_v25  ;;  %1928 = vmatpush1.msra.mxu1 %v2350_v44  ;;  %v2282_v25 = vld [vmem:[%s3474_s5 + $0x110] sm:$0xff]  ;;  %v1867_v30 = vrot.slane %v1857_v23, %v2870_v5  ;;  %v2017_v44 = vrot.slane %v2007_v61, %v2870_v5 }
 0x3b0   :  { %1760 = vmatprep.subr.mxu0 %v2447_v55  ;;  %1945 = vmatprep.subr.mxu1 %v2447_v55 }
 0x3b1   :  { %1761 = vmatpush2.msra.mxu0 %v1197_v27  ;;  %2374 = vmatpush2.msk.msra.mxu1 %vm1361_vm8, %v2373_v2  ;;  %v2008_v27 = vcombine.high %v3287_v13, %v3298_v16  ;;  %v1889_v35 = vcombine.low %v1867_v30, %v1881_v47  ;;  %v2039_v0 = vcombine.low %v2017_v44, %v2031_v31  ;;  %v2133_v2 = vld [vmem:[%s3476_s7 + $0x28] sm:$0xff] }
 0x3b2   :  { %1762 = vmatprep.subr.mxu0 %v2447_v55  ;;  %1947 = vmatprep.subr.mxu1 %v2447_v55 }
 0x3b3   :  { %1763 = vmatpush2.msra.mxu0 %v1196_v45  ;;  %1948 = vmatpush2.msra.mxu1 %v2372_v9  ;;  %v1874_v45 = vrot.slane %v1858_v21, %v2870_v5  ;;  %v2024_v56 = vrot.slane %v2008_v27, %v2870_v5 }
 0x3b4   :  { %1764 = vmatprep.subr.mxu0 %v2447_v55  ;;  %1949 = vmatprep.subr.mxu1 %v2447_v55 }
 0x3b5   :  { %1765 = vmatpush2.msra.mxu0 %v1195_v48  ;;  %1950 = vmatpush2.msra.mxu1 %v2371_v15  ;;  %v1888_v48 = vrot.slane %v1860_v22, %v2870_v5  ;;  %v2040_v41 = vcombine.low %v2024_v56, %v2038_v63  ;;  %v2135_v5 = vld [vmem:[%s3476_s7 + $0x38] sm:$0xff]  ;;  %v2378_v22 = vld [vmem:[%s3475_s6] ss:$0 sm:$0xff] }
 0x3b6   :  { %1766 = vmatprep.subr.mxu0 %v2447_v55  ;;  %1951 = vmatprep.subr.mxu1 %v2447_v55 }
 0x3b7   :  { %1767 = vmatpush2.msra.mxu0 %v1194_v38  ;;  %1952 = vmatpush2.msra.mxu1 %v2370_v20  ;;  %v2280_v38 = vld [vmem:[%s3474_s5 + $0x100] sm:$0xff]  ;;  %v1890_v53 = vcombine.low %v1874_v45, %v1888_v48 }
 0x3b8   :  { %1768 = vmatprep.subr.mxu0 %v2447_v55  ;;  %1953 = vmatprep.subr.mxu1 %v2447_v55 }
 0x3b9   :  { %1769 = vmatpush2.msra.mxu0 %v1193_v34  ;;  %1954 = vmatpush2.msra.mxu1 %v2369_v26  ;;  %v2275_v34 = vld [vmem:[%s3474_s5 + $0xd8] sm:$0xff] }
 0x3ba   :  { %1771 = vmatmul.mubr.f32.vlgmr.msra.gmra.mxu0 %v1698_v36  ;;  %2047 = vmatprep.subr.mxu0 %v2447_v55  ;;  %v2294_v36 = vld [vmem:[%s3474_s5 + $0x170] sm:$0xff] }
 0x3bb   :  { %2048 = vmatpush1.msra.mxu0 %v2287_v59  ;;  %1955 = vmatprep.subr.mxu1 %v2447_v55  ;;  %v2290_v59 = vld [vmem:[%s3474_s5 + $0x150] sm:$0xff] }
 0x3bc   :  { %2049 = vmatprep.subr.mxu0 %v2447_v55  ;;  %1956 = vmatpush2.msra.mxu1 %v2368_v32 }
 0x3bd   :  { %2050 = vmatpush1.msra.mxu0 %v2286_v1  ;;  %1957 = vmatprep.subr.mxu1 %v2447_v55  ;;  %v2134_v1 = vld [vmem:[%s3476_s7 + $0x30] sm:$0xff] }
 0x3be   :  { %2051 = vmatprep.subr.mxu0 %v2447_v55  ;;  %1958 = vmatpush2.msra.mxu1 %v2367_v39 }
 0x3bf   :  { %2052 = vmatpush1.msra.mxu0 %v2285_v8  ;;  %1959 = vmatprep.subr.mxu1 %v2447_v55  ;;  %v2128_v8 = vld [vmem:[%s3476_s7] sm:$0xff] }
 0x3c0   :  { %2053 = vmatprep.subr.mxu0 %v2447_v55  ;;  %1960 = vmatpush2.msra.mxu1 %v2366_v33 }
 0x3c1   :  { %2054 = vmatpush1.msra.mxu0 %v2284_v14  ;;  %2375 = vmatprep.mubr.msk.f32.mxu1 %vm1358_vm7, %v1890_v53 }
 0x3c2   :  { %2055 = vmatprep.subr.mxu0 %v2447_v55  ;;  %1962 = vmatmul.mubr.f32.vlgmr.msra.gmra.mxu1 %v1889_v35 }
 0x3c3   :  { %2056 = vmatpush1.msra.mxu0 %v2283_v19  ;;  %2377 = vmatprep.mubr.msk.f32.mxu0 %vm1358_vm7, %v2040_v41 }
 0x3c4   :  { %2057 = vmatprep.subr.mxu0 %v2447_v55  ;;  %2391 = vmatprep.subr.mxu1 %v2447_v55 }
 0x3c5   :  { %2058 = vmatpush1.msra.mxu0 %v2282_v25  ;;  %2392 = vmatpush3.msra.mxu1 %v2135_v5  ;;  %v2379_v25 = vld [vmem:[%s3477_s8] ss:$0 sm:$0xff] }
 0x3c6   :  { %2059 = vmatprep.subr.mxu0 %v2447_v55  ;;  %2393 = vmatprep.subr.mxu1 %v2447_v55 }
 0x3c7   :  { %2060 = vmatpush1.msra.mxu0 %v2281_v29  ;;  %2394 = vmatpush3.msra.mxu1 %v2134_v1 }
 0x3c8   :  { %2061 = vmatprep.subr.mxu0 %v2447_v55  ;;  %2395 = vmatprep.subr.mxu1 %v2447_v55 }
 0x3c9   :  { %2062 = vmatpush1.msra.mxu0 %v2280_v38  ;;  %2396 = vmatpush3.msra.mxu1 %v2133_v2 }
 0x3ca   :  { %2063 = vmatprep.subr.mxu0 %v2447_v55  ;;  %2397 = vmatprep.subr.mxu1 %v2447_v55 }
 0x3cb   :  { %2064 = vmatpush1.msra.mxu0 %v2279_v37  ;;  %2398 = vmatpush3.msra.mxu1 %v2132_v3 }
 0x3cc   :  { %2065 = vmatprep.subr.mxu0 %v2447_v55  ;;  %2399 = vmatprep.subr.mxu1 %v2447_v55 }
 0x3cd   :  { %2066 = vmatpush1.msra.mxu0 %v2278_v40  ;;  %2400 = vmatpush3.msra.mxu1 %v2131_v4 }
 0x3ce   :  { %2067 = vmatprep.subr.mxu0 %v2447_v55  ;;  %2401 = vmatprep.subr.mxu1 %v2447_v55 }
 0x3cf   :  { %2068 = vmatpush1.msra.mxu0 %v2277_v42  ;;  %2402 = vmatpush3.msra.mxu1 %v2130_v6 }
 0x3d0   :  { %2069 = vmatprep.subr.mxu0 %v2447_v55  ;;  %2403 = vmatprep.subr.mxu1 %v2447_v55 }
 0x3d1   :  { %2070 = vmatpush1.msra.mxu0 %v2276_v46  ;;  %2404 = vmatpush3.msra.mxu1 %v2129_v7 }
 0x3d2   :  { %2071 = vmatprep.subr.mxu0 %v2447_v55  ;;  %2405 = vmatprep.subr.mxu1 %v2447_v55 }
 0x3d3   :  { %2072 = vmatpush1.msra.mxu0 %v2275_v34  ;;  %2406 = vmatpush3.msra.mxu1 %v2128_v8 }
 0x3d4   :  { %2073 = vmatprep.subr.mxu0 %v2447_v55  ;;  %2407 = vmatprep.mubr.msk.f32.mxu1 %vm2449_vm9, %v2447_v55 }
 0x3d5   :  { %2074 = vmatpush1.msra.mxu0 %v2274_v43 }
 0x3d6   :  { %2075 = vmatprep.subr.mxu0 %v2447_v55 }
 0x3d7   :  { %2076 = vmatpush1.msra.mxu0 %v2273_v50 }
 0x3d8   :  { %2077 = vmatprep.subr.mxu0 %v2447_v55 }
 0x3d9   :  { %2078 = vmatpush1.msra.mxu0 %v2272_v52 }
 0x3da   :  { %2095 = vmatprep.subr.mxu0 %v2447_v55 }
 0x3db   :  { %2376 = vmatpush2.msk.msra.mxu0 %vm1361_vm8, %v2295_v58 }
 0x3dc   :  { %2097 = vmatprep.subr.mxu0 %v2447_v55 }
 0x3dd   :  { %2098 = vmatpush2.msra.mxu0 %v2294_v36 }
 0x3de   :  { %2099 = vmatprep.subr.mxu0 %v2447_v55 }
 0x3df   :  { %2100 = vmatpush2.msra.mxu0 %v2293_v54 }
 0x3e0   :  { %2101 = vmatprep.subr.mxu0 %v2447_v55 }
 0x3e1   :  { %2102 = vmatpush2.msra.mxu0 %v2292_v60 }
 0x3e2   :  { %2103 = vmatprep.subr.mxu0 %v2447_v55 }
 0x3e3   :  { %2104 = vmatpush2.msra.mxu0 %v2291_v62 }
 0x3e4   :  { %2105 = vmatprep.subr.mxu0 %v2447_v55 }
 0x3e5   :  { %2106 = vmatpush2.msra.mxu0 %v2290_v59 }
 0x3e6   :  { %2107 = vmatprep.subr.mxu0 %v2447_v55 }
 0x3e7   :  { %2108 = vmatpush2.msra.mxu0 %v2289_v57 }
 0x3e8   :  { %2109 = vmatprep.subr.mxu0 %v2447_v55 }
 0x3e9   :  { %2110 = vmatpush2.msra.mxu0 %v2288_v51 }
 0x3ea   :  { %2112 = vmatmul.mubr.f32.vlgmr.msra.gmra.mxu0 %v2039_v0 }
 0x44a   :  { %v1431_v9 = vpop.f32.mrf.mxu0 }
 0x44c   :  { %v1433_v10 = vpop.f32.mrf.mxu0 }
 0x44f   :  { %v1622_v11 = vpop.f32.mrf.mxu1 }
 0x451   :  { %v1624_v12 = vpop.f32.mrf.mxu1 }
 0x47a   :  { %v1772_v13 = vpop.f32.mrf.mxu0 }
 0x47b   :  { %v1773_v18 = vadd.f32 %v1772_v13, %v1622_v11 }
 0x47c   :  { %v1774_v14 = vpop.f32.mrf.mxu0 }
 0x482   :  { %v1963_v15 = vpop.f32.mrf.mxu1 }
 0x484   :  { %v1965_v16 = vpop.f32.mrf.mxu1 }
 0x4aa   :  { %v2113_v17 = vpop.f32.mrf.mxu0 }
 0x4ab   :  { %v2114_v19 = vadd.f32 %v2113_v17, %v1963_v15 }
 0x4ac   :  { %v2115_v20 = vpop.f32.mrf.mxu0 }
 0x4ad   :  { %v2117_v21 = vadd.f32 %v2114_v19, %v1773_v18 }
 0x4af   :  { %v2118_v23 = vadd.f32 %v2117_v21, %v1431_v9 }
 0x4b1   :  { %v2126_v24 = vadd.f32 %v2378_v22, %v2118_v23 }
 0x4b3   :  { %v2127_v55 = vmax.f32 %v2126_v24, 0.0 }
 0x4b5   :  { %2408 = vmatmul.mubr.msk.f32.vlgmr.msra.gmra.mxu1 %vm2143_vm10, %v2127_v55 }
 0x575   :  { %v2213_v26 = vpop.f32.mrf.mxu1 }
 0x576   :  { %v2214_v27 = vadd.f32 %v2379_v25, %v2213_v26 }
 0x577   :  { %v2409_v28 = vpop.f32.mrf.mxu1 }
 0x578   :  { %v2218_v29 = vsel %vm2217_vm11, %v2214_v27, -inf }
 0x579   :  { %2219 = vmax.xlane.f32.xlu0 %v2218_v29 }
 0x602   :  { %v2220_v32 = vpop.xlane.xlu0 %2219 }
 0x603   :  { %v2221_v45 = vsub.f32 %v2214_v27, %v2220_v32 }
 0x605   :  { %v2222_v48 = vmul.f32 1.442695, %v2221_v45 }
 0x607   :  { %2429 = vpow2.f32 %v2222_v48 }
 0x614   :  { %v2430_v30 = vpop.eup %2429 }
 0x615   :  { %v2224_v47 = vsel %vm2217_vm11, %v2430_v30, 0.0 }
 0x616   :  { %2225 = vadd.xlane.f32.xlu0 %v2224_v47 }
 0x69f   :  { %v2226_v38 = vpop.xlane.xlu0 %2225 }
 0x6a0   :  { %2431 = vrcp.f32 %v2226_v38 }
 0x6ad   :  { %v2432_v39 = vpop.eup %2431 }
 0x6ae   :  { %v2228_v56 = vmul.f32 %v2432_v39, %v2430_v30 }
 0x6b0   :  { %2229 = vst.msk [vmem:[%s3478_s9] sm:$0xff] %vm2217_vm11, %v2228_v56 }

</bundles_post_ra>
